<compile_context>
chip_gen: v6e
topology: v6e:2x2x1
jax: 0.10.0
libtpu: 0.0.40
codegen_flags: <defaults>
</compile_context>

<pallas_src>
import math

import jax
import jax.numpy as jnp
from jax.experimental import pallas as pl
from jax.experimental.pallas import tpu as pltpu

# ---- Acrobot physical constants (match the PyTorch module attributes) ------
DT = 0.2
L1 = 1.0
L2 = 1.0
M1 = 1.0
M2 = 1.0
LC1 = 0.5
LC2 = 0.5
I1 = 1.0
I2 = 1.0
G = 9.8
PI = math.pi
MAX_VEL_1 = 4.0 * math.pi
MAX_VEL_2 = 9.0 * math.pi


def _dsdt(th1, th2, dth1, dth2, tau):
    """Acrobot dynamics ('book' formulation). Elementwise on arrays."""
    cos_t2 = jnp.cos(th2)
    sin_t2 = jnp.sin(th2)
    d1 = M1 * LC1 ** 2 + M2 * (L1 ** 2 + LC2 ** 2 + 2.0 * L1 * LC2 * cos_t2) + I1 + I2
    d2 = M2 * (LC2 ** 2 + L1 * LC2 * cos_t2) + I2
    phi2 = M2 * LC2 * G * jnp.cos(th1 + th2 - PI / 2.0)
    phi1 = (-M2 * L1 * LC2 * dth2 * dth2 * sin_t2
            - 2.0 * M2 * L1 * LC2 * dth2 * dth1 * sin_t2
            + (M1 * LC1 + M2 * L1) * G * jnp.cos(th1 - PI / 2.0)
            + phi2)
    ddth2 = (tau + (d2 / d1) * phi1
             - M2 * L1 * LC2 * dth1 * dth1 * sin_t2
             - phi2) / (M2 * LC2 ** 2 + I2 - d2 * d2 / d1)
    ddth1 = -(d2 * ddth2 + phi1) / d1
    # torque derivative is identically zero -> torque stays constant; not carried.
    return dth1, dth2, ddth1, ddth2


def _axpy(y, a, k):
    return tuple(yi + a * ki for yi, ki in zip(y, k))


def _rk4_step(th1, th2, dth1, dth2, tau):
    """Single RK4 step over [0, DT] (matches rk4(derivs, y0, [0, dt]))."""
    dt = DT
    dt2 = DT / 2.0
    y0 = (th1, th2, dth1, dth2)
    k1 = _dsdt(*y0, tau)
    k2 = _dsdt(*_axpy(y0, dt2, k1), tau)
    k3 = _dsdt(*_axpy(y0, dt2, k2), tau)
    k4 = _dsdt(*_axpy(y0, dt, k3), tau)
    return tuple(
        y + (dt / 6.0) * (a + 2.0 * b + 2.0 * c + d)
        for y, a, b, c, d in zip(y0, k1, k2, k3, k4)
    )


def _wrap(x, m, M):
    """Single conditional wrap, exactly mirroring the PyTorch `wrap`."""
    diff = M - m
    x = x - jnp.where(x > M, diff, 0.0)
    x = x + jnp.where(x < m, diff, 0.0)
    return x


# ----------------------------- Pallas kernel --------------------------------
def acrobot_kernel(th1_ref, th2_ref, dth1_ref, dth2_ref, tau_ref,
                   nth1_ref, nth2_ref, ndth1_ref, ndth2_ref):
    th1 = th1_ref[...]
    th2 = th2_ref[...]
    dth1 = dth1_ref[...]
    dth2 = dth2_ref[...]
    tau = tau_ref[...]

    nth1, nth2, ndth1, ndth2 = _rk4_step(th1, th2, dth1, dth2, tau)

    nth1_ref[...] = _wrap(nth1, -PI, PI)
    nth2_ref[...] = _wrap(nth2, -PI, PI)
    ndth1_ref[...] = jnp.clip(ndth1, -MAX_VEL_1, MAX_VEL_1)
    ndth2_ref[...] = jnp.clip(ndth2, -MAX_VEL_2, MAX_VEL_2)


def acrobot_step(state, action, *, block_bytes=1 << 20, vmem_limit_bytes=None):
    """Pallas implementation of Acrobot.forward.

    Args:
      state: dict with 'theta_1', 'theta_2', 'theta_1_dot', 'theta_2_dot';
             each any shape flattening to (B,).
      action: torque, any shape flattening to (B,).
      block_bytes: target VMEM tile size per stream (~1 MiB default: safe on
             v5e/v6e/v7x with 9 double-buffered streams).

    Returns:
      dict of next-state arrays, each shaped (B, 1) (like the PyTorch module).
    """
    th1 = jnp.asarray(state["theta_1"], jnp.float32).reshape(-1)
    th2 = jnp.asarray(state["theta_2"], jnp.float32).reshape(-1)
    dth1 = jnp.asarray(state["theta_1_dot"], jnp.float32).reshape(-1)
    dth2 = jnp.asarray(state["theta_2_dot"], jnp.float32).reshape(-1)
    tau = jnp.asarray(action, jnp.float32).reshape(-1)
    n = th1.shape[0]
    assert th2.shape == (n,) and dth1.shape == (n,) and dth2.shape == (n,) and tau.shape == (n,)

    # ---- lane-dense 2-D layout for the flat batch ---------------------------
    # Last dim is a multiple of 128 (512 for big batches) so stores are full
    # unmasked vst's; rows are tiled into large blocks (~block_bytes/stream).
    lanes = 512 if n >= 512 * 64 else 128
    rows_needed = pl.cdiv(n, lanes)
    rows_needed = pl.cdiv(rows_needed, 8) * 8                 # sublane multiple of 8
    block_rows = max(8, (block_bytes // (lanes * 4)) // 8 * 8)
    block_rows = min(block_rows, rows_needed)
    rows = pl.cdiv(rows_needed, block_rows) * block_rows      # grid divides evenly
    n_pad = rows * lanes
    grid = (rows // block_rows,)

    def to2d(x):
        return jnp.pad(x, (0, n_pad - n)).reshape(rows, lanes)

    inputs = tuple(to2d(x) for x in (th1, th2, dth1, dth2, tau))

    spec = pl.BlockSpec((block_rows, lanes), lambda i: (i, 0))
    out_sds = jax.ShapeDtypeStruct((rows, lanes), jnp.float32)

    tile_bytes = block_rows * lanes * 4
    if vmem_limit_bytes is None:
        # 5 input + 4 output streams, double-buffered, plus headroom.
        # Stays well under v7x's 64 MiB physical VMEM at the default tile size.
        vmem_limit_bytes = max(32 * 1024 * 1024, 18 * tile_bytes + 8 * 1024 * 1024)

    nth1, nth2, ndth1, ndth2 = pl.pallas_call(
        acrobot_kernel,
        out_shape=(out_sds, out_sds, out_sds, out_sds),
        grid=grid,
        in_specs=[spec, spec, spec, spec, spec],
        out_specs=(spec, spec, spec, spec),
        # Reuse the (freshly padded) state buffers for the next state — avoids
        # four new HBM allocations per step in a rollout loop.
        input_output_aliases={0: 0, 1: 1, 2: 2, 3: 3},
        compiler_params=pltpu.CompilerParams(
            dimension_semantics=("parallel",),
            vmem_limit_bytes=int(vmem_limit_bytes),
        ),
    )(*inputs)

    def back(x):
        return x.reshape(-1)[:n].reshape(n, 1)

    return dict(theta_1=back(nth1), theta_2=back(nth2),
                theta_1_dot=back(ndth1), theta_2_dot=back(ndth2))


# ----------------------------- pure-JAX reference ----------------------------
def acrobot_step_ref(state, action):
    th1 = jnp.asarray(state["theta_1"], jnp.float32).reshape(-1)
    th2 = jnp.asarray(state["theta_2"], jnp.float32).reshape(-1)
    dth1 = jnp.asarray(state["theta_1_dot"], jnp.float32).reshape(-1)
    dth2 = jnp.asarray(state["theta_2_dot"], jnp.float32).reshape(-1)
    tau = jnp.asarray(action, jnp.float32).reshape(-1)

    nth1, nth2, ndth1, ndth2 = _rk4_step(th1, th2, dth1, dth2, tau)
    nth1 = _wrap(nth1, -PI, PI)
    nth2 = _wrap(nth2, -PI, PI)
    ndth1 = jnp.clip(ndth1, -MAX_VEL_1, MAX_VEL_1)
    ndth2 = jnp.clip(ndth2, -MAX_VEL_2, MAX_VEL_2)
    return dict(theta_1=nth1.reshape(-1, 1), theta_2=nth2.reshape(-1, 1),
                theta_1_dot=ndth1.reshape(-1, 1), theta_2_dot=ndth2.reshape(-1, 1))


if __name__ == "__main__":
    key = jax.random.PRNGKey(0)
    k1, k2, k3, k4, k5 = jax.random.split(key, 5)

    # Small flat batch of environments; intentionally not a multiple of 8*128
    # so the wrapper's padding path is exercised.
    B = 300
    theta_1 = jax.random.uniform(k1, (B,), jnp.float32, minval=-PI, maxval=PI)
    theta_2 = jax.random.uniform(k2, (B,), jnp.float32, minval=-PI, maxval=PI)
    theta_1_dot = jax.random.uniform(k3, (B,), jnp.float32,
                                     minval=-MAX_VEL_1, maxval=MAX_VEL_1)
    theta_2_dot = jax.random.uniform(k4, (B,), jnp.float32,
                                     minval=-MAX_VEL_2, maxval=MAX_VEL_2)
    # Discrete torques {-1, 0, +1} like AVAIL_TORQUE.
    action = (jax.random.randint(k5, (B,), 0, 3) - 1).astype(jnp.float32)

    state = dict(theta_1=theta_1, theta_2=theta_2,
                 theta_1_dot=theta_1_dot, theta_2_dot=theta_2_dot)

    out = acrobot_step(state, action)
    jax.block_until_ready(out)

    ref = acrobot_step_ref(state, action)
    for name in ("theta_1", "theta_2", "theta_1_dot", "theta_2_dot"):
        assert out[name].shape == (B, 1), (name, out[name].shape)
        assert jnp.allclose(out[name], ref[name], atol=1e-5, rtol=1e-5), name

    print("KERNEL_OK")
</pallas_src>

<mosaic_0001>
module attributes {stable_mosaic.version = 11 : i64} {
  func.func @acrobot_kernel(%arg0: i32, %arg1: memref<8x128xf32, #tpu.memory_space<vmem>>, %arg2: memref<8x128xf32, #tpu.memory_space<vmem>>, %arg3: memref<8x128xf32, #tpu.memory_space<vmem>>, %arg4: memref<8x128xf32, #tpu.memory_space<vmem>>, %arg5: memref<8x128xf32, #tpu.memory_space<vmem>>, %arg6: memref<8x128xf32, #tpu.memory_space<vmem>>, %arg7: memref<8x128xf32, #tpu.memory_space<vmem>>, %arg8: memref<8x128xf32, #tpu.memory_space<vmem>>, %arg9: memref<8x128xf32, #tpu.memory_space<vmem>>) attributes {dimension_semantics = [#tpu.dimension_semantics<parallel>], iteration_bounds = array<i64: 1>, scalar_prefetch = 0 : i64, scratch_operands = 0 : i64, tpu.core_type = #tpu.core_type<tc>, window_params = [{transform_indices = @transform_0, window_bounds = array<i64: 8, 128>}, {transform_indices = @transform_1, window_bounds = array<i64: 8, 128>}, {transform_indices = @transform_2, window_bounds = array<i64: 8, 128>}, {transform_indices = @transform_3, window_bounds = array<i64: 8, 128>}, {transform_indices = @transform_4, window_bounds = array<i64: 8, 128>}, {transform_indices = @transform_5, window_bounds = array<i64: 8, 128>}, {transform_indices = @transform_6, window_bounds = array<i64: 8, 128>}, {transform_indices = @transform_7, window_bounds = array<i64: 8, 128>}, {transform_indices = @transform_8, window_bounds = array<i64: 8, 128>}]} {
    %c0 = arith.constant 0 : index
    %c0_0 = arith.constant 0 : index
    %0 = vector.load %arg1[%c0, %c0_0] : memref<8x128xf32, #tpu.memory_space<vmem>>, vector<8x128xf32>
    %c0_1 = arith.constant 0 : index
    %c0_2 = arith.constant 0 : index
    %1 = vector.load %arg2[%c0_1, %c0_2] : memref<8x128xf32, #tpu.memory_space<vmem>>, vector<8x128xf32>
    %c0_3 = arith.constant 0 : index
    %c0_4 = arith.constant 0 : index
    %2 = vector.load %arg3[%c0_3, %c0_4] : memref<8x128xf32, #tpu.memory_space<vmem>>, vector<8x128xf32>
    %c0_5 = arith.constant 0 : index
    %c0_6 = arith.constant 0 : index
    %3 = vector.load %arg4[%c0_5, %c0_6] : memref<8x128xf32, #tpu.memory_space<vmem>>, vector<8x128xf32>
    %c0_7 = arith.constant 0 : index
    %c0_8 = arith.constant 0 : index
    %4 = vector.load %arg5[%c0_7, %c0_8] : memref<8x128xf32, #tpu.memory_space<vmem>>, vector<8x128xf32>
    %5 = math.cos %1 : vector<8x128xf32>
    %6 = math.sin %1 : vector<8x128xf32>
    %cst = arith.constant 1.000000e+00 : f32
    %7 = vector.broadcast %cst : f32 to vector<8x128xf32>
    %8 = arith.mulf %7, %5 : vector<8x128xf32>
    %cst_9 = arith.constant 1.250000e+00 : f32
    %9 = vector.broadcast %cst_9 : f32 to vector<8x128xf32>
    %10 = arith.addf %9, %8 : vector<8x128xf32>
    %cst_10 = arith.constant 1.000000e+00 : f32
    %11 = vector.broadcast %cst_10 : f32 to vector<8x128xf32>
    %12 = arith.mulf %11, %10 : vector<8x128xf32>
    %cst_11 = arith.constant 2.500000e-01 : f32
    %13 = vector.broadcast %cst_11 : f32 to vector<8x128xf32>
    %14 = arith.addf %13, %12 : vector<8x128xf32>
    %cst_12 = arith.constant 1.000000e+00 : f32
    %15 = vector.broadcast %cst_12 : f32 to vector<8x128xf32>
    %16 = arith.addf %14, %15 : vector<8x128xf32>
    %cst_13 = arith.constant 1.000000e+00 : f32
    %17 = vector.broadcast %cst_13 : f32 to vector<8x128xf32>
    %18 = arith.addf %16, %17 : vector<8x128xf32>
    %cst_14 = arith.constant 5.000000e-01 : f32
    %19 = vector.broadcast %cst_14 : f32 to vector<8x128xf32>
    %20 = arith.mulf %19, %5 : vector<8x128xf32>
    %cst_15 = arith.constant 2.500000e-01 : f32
    %21 = vector.broadcast %cst_15 : f32 to vector<8x128xf32>
    %22 = arith.addf %21, %20 : vector<8x128xf32>
    %cst_16 = arith.constant 1.000000e+00 : f32
    %23 = vector.broadcast %cst_16 : f32 to vector<8x128xf32>
    %24 = arith.mulf %23, %22 : vector<8x128xf32>
    %cst_17 = arith.constant 1.000000e+00 : f32
    %25 = vector.broadcast %cst_17 : f32 to vector<8x128xf32>
    %26 = arith.addf %24, %25 : vector<8x128xf32>
    %27 = arith.addf %0, %1 : vector<8x128xf32>
    %cst_18 = arith.constant 1.57079637 : f32
    %28 = vector.broadcast %cst_18 : f32 to vector<8x128xf32>
    %29 = arith.subf %27, %28 : vector<8x128xf32>
    %30 = math.cos %29 : vector<8x128xf32>
    %cst_19 = arith.constant 4.900000e+00 : f32
    %31 = vector.broadcast %cst_19 : f32 to vector<8x128xf32>
    %32 = arith.mulf %31, %30 : vector<8x128xf32>
    %cst_20 = arith.constant -5.000000e-01 : f32
    %33 = vector.broadcast %cst_20 : f32 to vector<8x128xf32>
    %34 = arith.mulf %33, %3 : vector<8x128xf32>
    %35 = arith.mulf %34, %3 : vector<8x128xf32>
    %36 = arith.mulf %35, %6 : vector<8x128xf32>
    %cst_21 = arith.constant 1.000000e+00 : f32
    %37 = vector.broadcast %cst_21 : f32 to vector<8x128xf32>
    %38 = arith.mulf %37, %3 : vector<8x128xf32>
    %39 = arith.mulf %38, %2 : vector<8x128xf32>
    %40 = arith.mulf %39, %6 : vector<8x128xf32>
    %41 = arith.subf %36, %40 : vector<8x128xf32>
    %cst_22 = arith.constant 1.57079637 : f32
    %42 = vector.broadcast %cst_22 : f32 to vector<8x128xf32>
    %43 = arith.subf %0, %42 : vector<8x128xf32>
    %44 = math.cos %43 : vector<8x128xf32>
    %cst_23 = arith.constant 1.470000e+01 : f32
    %45 = vector.broadcast %cst_23 : f32 to vector<8x128xf32>
    %46 = arith.mulf %45, %44 : vector<8x128xf32>
    %47 = arith.addf %41, %46 : vector<8x128xf32>
    %48 = arith.addf %47, %32 : vector<8x128xf32>
    %49 = arith.divf %26, %18 : vector<8x128xf32>
    %50 = arith.mulf %49, %48 : vector<8x128xf32>
    %51 = arith.addf %4, %50 : vector<8x128xf32>
    %cst_24 = arith.constant 5.000000e-01 : f32
    %52 = vector.broadcast %cst_24 : f32 to vector<8x128xf32>
    %53 = arith.mulf %52, %2 : vector<8x128xf32>
    %54 = arith.mulf %53, %2 : vector<8x128xf32>
    %55 = arith.mulf %54, %6 : vector<8x128xf32>
    %56 = arith.subf %51, %55 : vector<8x128xf32>
    %57 = arith.subf %56, %32 : vector<8x128xf32>
    %58 = arith.mulf %26, %26 : vector<8x128xf32>
    %59 = arith.divf %58, %18 : vector<8x128xf32>
    %cst_25 = arith.constant 1.250000e+00 : f32
    %60 = vector.broadcast %cst_25 : f32 to vector<8x128xf32>
    %61 = arith.subf %60, %59 : vector<8x128xf32>
    %62 = arith.divf %57, %61 : vector<8x128xf32>
    %63 = arith.mulf %26, %62 : vector<8x128xf32>
    %64 = arith.addf %63, %48 : vector<8x128xf32>
    %cst_26 = arith.constant 0.000000e+00 : f32
    %65 = vector.broadcast %cst_26 : f32 to vector<8x128xf32>
    %66 = arith.subf %65, %64 : vector<8x128xf32>
    %67 = arith.divf %66, %18 : vector<8x128xf32>
    %cst_27 = arith.constant 1.000000e-01 : f32
    %68 = vector.broadcast %cst_27 : f32 to vector<8x128xf32>
    %69 = arith.mulf %68, %2 : vector<8x128xf32>
    %70 = arith.addf %0, %69 : vector<8x128xf32>
    %cst_28 = arith.constant 1.000000e-01 : f32
    %71 = vector.broadcast %cst_28 : f32 to vector<8x128xf32>
    %72 = arith.mulf %71, %3 : vector<8x128xf32>
    %73 = arith.addf %1, %72 : vector<8x128xf32>
    %cst_29 = arith.constant 1.000000e-01 : f32
    %74 = vector.broadcast %cst_29 : f32 to vector<8x128xf32>
    %75 = arith.mulf %74, %67 : vector<8x128xf32>
    %76 = arith.addf %2, %75 : vector<8x128xf32>
    %cst_30 = arith.constant 1.000000e-01 : f32
    %77 = vector.broadcast %cst_30 : f32 to vector<8x128xf32>
    %78 = arith.mulf %77, %62 : vector<8x128xf32>
    %79 = arith.addf %3, %78 : vector<8x128xf32>
    %80 = math.cos %73 : vector<8x128xf32>
    %81 = math.sin %73 : vector<8x128xf32>
    %cst_31 = arith.constant 1.000000e+00 : f32
    %82 = vector.broadcast %cst_31 : f32 to vector<8x128xf32>
    %83 = arith.mulf %82, %80 : vector<8x128xf32>
    %cst_32 = arith.constant 1.250000e+00 : f32
    %84 = vector.broadcast %cst_32 : f32 to vector<8x128xf32>
    %85 = arith.addf %84, %83 : vector<8x128xf32>
    %cst_33 = arith.constant 1.000000e+00 : f32
    %86 = vector.broadcast %cst_33 : f32 to vector<8x128xf32>
    %87 = arith.mulf %86, %85 : vector<8x128xf32>
    %cst_34 = arith.constant 2.500000e-01 : f32
    %88 = vector.broadcast %cst_34 : f32 to vector<8x128xf32>
    %89 = arith.addf %88, %87 : vector<8x128xf32>
    %cst_35 = arith.constant 1.000000e+00 : f32
    %90 = vector.broadcast %cst_35 : f32 to vector<8x128xf32>
    %91 = arith.addf %89, %90 : vector<8x128xf32>
    %cst_36 = arith.constant 1.000000e+00 : f32
    %92 = vector.broadcast %cst_36 : f32 to vector<8x128xf32>
    %93 = arith.addf %91, %92 : vector<8x128xf32>
    %cst_37 = arith.constant 5.000000e-01 : f32
    %94 = vector.broadcast %cst_37 : f32 to vector<8x128xf32>
    %95 = arith.mulf %94, %80 : vector<8x128xf32>
    %cst_38 = arith.constant 2.500000e-01 : f32
    %96 = vector.broadcast %cst_38 : f32 to vector<8x128xf32>
    %97 = arith.addf %96, %95 : vector<8x128xf32>
    %cst_39 = arith.constant 1.000000e+00 : f32
    %98 = vector.broadcast %cst_39 : f32 to vector<8x128xf32>
    %99 = arith.mulf %98, %97 : vector<8x128xf32>
    %cst_40 = arith.constant 1.000000e+00 : f32
    %100 = vector.broadcast %cst_40 : f32 to vector<8x128xf32>
    %101 = arith.addf %99, %100 : vector<8x128xf32>
    %102 = arith.addf %70, %73 : vector<8x128xf32>
    %cst_41 = arith.constant 1.57079637 : f32
    %103 = vector.broadcast %cst_41 : f32 to vector<8x128xf32>
    %104 = arith.subf %102, %103 : vector<8x128xf32>
    %105 = math.cos %104 : vector<8x128xf32>
    %cst_42 = arith.constant 4.900000e+00 : f32
    %106 = vector.broadcast %cst_42 : f32 to vector<8x128xf32>
    %107 = arith.mulf %106, %105 : vector<8x128xf32>
    %cst_43 = arith.constant -5.000000e-01 : f32
    %108 = vector.broadcast %cst_43 : f32 to vector<8x128xf32>
    %109 = arith.mulf %108, %79 : vector<8x128xf32>
    %110 = arith.mulf %109, %79 : vector<8x128xf32>
    %111 = arith.mulf %110, %81 : vector<8x128xf32>
    %cst_44 = arith.constant 1.000000e+00 : f32
    %112 = vector.broadcast %cst_44 : f32 to vector<8x128xf32>
    %113 = arith.mulf %112, %79 : vector<8x128xf32>
    %114 = arith.mulf %113, %76 : vector<8x128xf32>
    %115 = arith.mulf %114, %81 : vector<8x128xf32>
    %116 = arith.subf %111, %115 : vector<8x128xf32>
    %cst_45 = arith.constant 1.57079637 : f32
    %117 = vector.broadcast %cst_45 : f32 to vector<8x128xf32>
    %118 = arith.subf %70, %117 : vector<8x128xf32>
    %119 = math.cos %118 : vector<8x128xf32>
    %cst_46 = arith.constant 1.470000e+01 : f32
    %120 = vector.broadcast %cst_46 : f32 to vector<8x128xf32>
    %121 = arith.mulf %120, %119 : vector<8x128xf32>
    %122 = arith.addf %116, %121 : vector<8x128xf32>
    %123 = arith.addf %122, %107 : vector<8x128xf32>
    %124 = arith.divf %101, %93 : vector<8x128xf32>
    %125 = arith.mulf %124, %123 : vector<8x128xf32>
    %126 = arith.addf %4, %125 : vector<8x128xf32>
    %cst_47 = arith.constant 5.000000e-01 : f32
    %127 = vector.broadcast %cst_47 : f32 to vector<8x128xf32>
    %128 = arith.mulf %127, %76 : vector<8x128xf32>
    %129 = arith.mulf %128, %76 : vector<8x128xf32>
    %130 = arith.mulf %129, %81 : vector<8x128xf32>
    %131 = arith.subf %126, %130 : vector<8x128xf32>
    %132 = arith.subf %131, %107 : vector<8x128xf32>
    %133 = arith.mulf %101, %101 : vector<8x128xf32>
    %134 = arith.divf %133, %93 : vector<8x128xf32>
    %cst_48 = arith.constant 1.250000e+00 : f32
    %135 = vector.broadcast %cst_48 : f32 to vector<8x128xf32>
    %136 = arith.subf %135, %134 : vector<8x128xf32>
    %137 = arith.divf %132, %136 : vector<8x128xf32>
    %138 = arith.mulf %101, %137 : vector<8x128xf32>
    %139 = arith.addf %138, %123 : vector<8x128xf32>
    %cst_49 = arith.constant 0.000000e+00 : f32
    %140 = vector.broadcast %cst_49 : f32 to vector<8x128xf32>
    %141 = arith.subf %140, %139 : vector<8x128xf32>
    %142 = arith.divf %141, %93 : vector<8x128xf32>
    %cst_50 = arith.constant 1.000000e-01 : f32
    %143 = vector.broadcast %cst_50 : f32 to vector<8x128xf32>
    %144 = arith.mulf %143, %76 : vector<8x128xf32>
    %145 = arith.addf %0, %144 : vector<8x128xf32>
    %cst_51 = arith.constant 1.000000e-01 : f32
    %146 = vector.broadcast %cst_51 : f32 to vector<8x128xf32>
    %147 = arith.mulf %146, %79 : vector<8x128xf32>
    %148 = arith.addf %1, %147 : vector<8x128xf32>
    %cst_52 = arith.constant 1.000000e-01 : f32
    %149 = vector.broadcast %cst_52 : f32 to vector<8x128xf32>
    %150 = arith.mulf %149, %142 : vector<8x128xf32>
    %151 = arith.addf %2, %150 : vector<8x128xf32>
    %cst_53 = arith.constant 1.000000e-01 : f32
    %152 = vector.broadcast %cst_53 : f32 to vector<8x128xf32>
    %153 = arith.mulf %152, %137 : vector<8x128xf32>
    %154 = arith.addf %3, %153 : vector<8x128xf32>
    %155 = math.cos %148 : vector<8x128xf32>
    %156 = math.sin %148 : vector<8x128xf32>
    %cst_54 = arith.constant 1.000000e+00 : f32
    %157 = vector.broadcast %cst_54 : f32 to vector<8x128xf32>
    %158 = arith.mulf %157, %155 : vector<8x128xf32>
    %cst_55 = arith.constant 1.250000e+00 : f32
    %159 = vector.broadcast %cst_55 : f32 to vector<8x128xf32>
    %160 = arith.addf %159, %158 : vector<8x128xf32>
    %cst_56 = arith.constant 1.000000e+00 : f32
    %161 = vector.broadcast %cst_56 : f32 to vector<8x128xf32>
    %162 = arith.mulf %161, %160 : vector<8x128xf32>
    %cst_57 = arith.constant 2.500000e-01 : f32
    %163 = vector.broadcast %cst_57 : f32 to vector<8x128xf32>
    %164 = arith.addf %163, %162 : vector<8x128xf32>
    %cst_58 = arith.constant 1.000000e+00 : f32
    %165 = vector.broadcast %cst_58 : f32 to vector<8x128xf32>
    %166 = arith.addf %164, %165 : vector<8x128xf32>
    %cst_59 = arith.constant 1.000000e+00 : f32
    %167 = vector.broadcast %cst_59 : f32 to vector<8x128xf32>
    %168 = arith.addf %166, %167 : vector<8x128xf32>
    %cst_60 = arith.constant 5.000000e-01 : f32
    %169 = vector.broadcast %cst_60 : f32 to vector<8x128xf32>
    %170 = arith.mulf %169, %155 : vector<8x128xf32>
    %cst_61 = arith.constant 2.500000e-01 : f32
    %171 = vector.broadcast %cst_61 : f32 to vector<8x128xf32>
    %172 = arith.addf %171, %170 : vector<8x128xf32>
    %cst_62 = arith.constant 1.000000e+00 : f32
    %173 = vector.broadcast %cst_62 : f32 to vector<8x128xf32>
    %174 = arith.mulf %173, %172 : vector<8x128xf32>
    %cst_63 = arith.constant 1.000000e+00 : f32
    %175 = vector.broadcast %cst_63 : f32 to vector<8x128xf32>
    %176 = arith.addf %174, %175 : vector<8x128xf32>
    %177 = arith.addf %145, %148 : vector<8x128xf32>
    %cst_64 = arith.constant 1.57079637 : f32
    %178 = vector.broadcast %cst_64 : f32 to vector<8x128xf32>
    %179 = arith.subf %177, %178 : vector<8x128xf32>
    %180 = math.cos %179 : vector<8x128xf32>
    %cst_65 = arith.constant 4.900000e+00 : f32
    %181 = vector.broadcast %cst_65 : f32 to vector<8x128xf32>
    %182 = arith.mulf %181, %180 : vector<8x128xf32>
    %cst_66 = arith.constant -5.000000e-01 : f32
    %183 = vector.broadcast %cst_66 : f32 to vector<8x128xf32>
    %184 = arith.mulf %183, %154 : vector<8x128xf32>
    %185 = arith.mulf %184, %154 : vector<8x128xf32>
    %186 = arith.mulf %185, %156 : vector<8x128xf32>
    %cst_67 = arith.constant 1.000000e+00 : f32
    %187 = vector.broadcast %cst_67 : f32 to vector<8x128xf32>
    %188 = arith.mulf %187, %154 : vector<8x128xf32>
    %189 = arith.mulf %188, %151 : vector<8x128xf32>
    %190 = arith.mulf %189, %156 : vector<8x128xf32>
    %191 = arith.subf %186, %190 : vector<8x128xf32>
    %cst_68 = arith.constant 1.57079637 : f32
    %192 = vector.broadcast %cst_68 : f32 to vector<8x128xf32>
    %193 = arith.subf %145, %192 : vector<8x128xf32>
    %194 = math.cos %193 : vector<8x128xf32>
    %cst_69 = arith.constant 1.470000e+01 : f32
    %195 = vector.broadcast %cst_69 : f32 to vector<8x128xf32>
    %196 = arith.mulf %195, %194 : vector<8x128xf32>
    %197 = arith.addf %191, %196 : vector<8x128xf32>
    %198 = arith.addf %197, %182 : vector<8x128xf32>
    %199 = arith.divf %176, %168 : vector<8x128xf32>
    %200 = arith.mulf %199, %198 : vector<8x128xf32>
    %201 = arith.addf %4, %200 : vector<8x128xf32>
    %cst_70 = arith.constant 5.000000e-01 : f32
    %202 = vector.broadcast %cst_70 : f32 to vector<8x128xf32>
    %203 = arith.mulf %202, %151 : vector<8x128xf32>
    %204 = arith.mulf %203, %151 : vector<8x128xf32>
    %205 = arith.mulf %204, %156 : vector<8x128xf32>
    %206 = arith.subf %201, %205 : vector<8x128xf32>
    %207 = arith.subf %206, %182 : vector<8x128xf32>
    %208 = arith.mulf %176, %176 : vector<8x128xf32>
    %209 = arith.divf %208, %168 : vector<8x128xf32>
    %cst_71 = arith.constant 1.250000e+00 : f32
    %210 = vector.broadcast %cst_71 : f32 to vector<8x128xf32>
    %211 = arith.subf %210, %209 : vector<8x128xf32>
    %212 = arith.divf %207, %211 : vector<8x128xf32>
    %213 = arith.mulf %176, %212 : vector<8x128xf32>
    %214 = arith.addf %213, %198 : vector<8x128xf32>
    %cst_72 = arith.constant 0.000000e+00 : f32
    %215 = vector.broadcast %cst_72 : f32 to vector<8x128xf32>
    %216 = arith.subf %215, %214 : vector<8x128xf32>
    %217 = arith.divf %216, %168 : vector<8x128xf32>
    %cst_73 = arith.constant 2.000000e-01 : f32
    %218 = vector.broadcast %cst_73 : f32 to vector<8x128xf32>
    %219 = arith.mulf %218, %151 : vector<8x128xf32>
    %220 = arith.addf %0, %219 : vector<8x128xf32>
    %cst_74 = arith.constant 2.000000e-01 : f32
    %221 = vector.broadcast %cst_74 : f32 to vector<8x128xf32>
    %222 = arith.mulf %221, %154 : vector<8x128xf32>
    %223 = arith.addf %1, %222 : vector<8x128xf32>
    %cst_75 = arith.constant 2.000000e-01 : f32
    %224 = vector.broadcast %cst_75 : f32 to vector<8x128xf32>
    %225 = arith.mulf %224, %217 : vector<8x128xf32>
    %226 = arith.addf %2, %225 : vector<8x128xf32>
    %cst_76 = arith.constant 2.000000e-01 : f32
    %227 = vector.broadcast %cst_76 : f32 to vector<8x128xf32>
    %228 = arith.mulf %227, %212 : vector<8x128xf32>
    %229 = arith.addf %3, %228 : vector<8x128xf32>
    %230 = math.cos %223 : vector<8x128xf32>
    %231 = math.sin %223 : vector<8x128xf32>
    %cst_77 = arith.constant 1.000000e+00 : f32
    %232 = vector.broadcast %cst_77 : f32 to vector<8x128xf32>
    %233 = arith.mulf %232, %230 : vector<8x128xf32>
    %cst_78 = arith.constant 1.250000e+00 : f32
    %234 = vector.broadcast %cst_78 : f32 to vector<8x128xf32>
    %235 = arith.addf %234, %233 : vector<8x128xf32>
    %cst_79 = arith.constant 1.000000e+00 : f32
    %236 = vector.broadcast %cst_79 : f32 to vector<8x128xf32>
    %237 = arith.mulf %236, %235 : vector<8x128xf32>
    %cst_80 = arith.constant 2.500000e-01 : f32
    %238 = vector.broadcast %cst_80 : f32 to vector<8x128xf32>
    %239 = arith.addf %238, %237 : vector<8x128xf32>
    %cst_81 = arith.constant 1.000000e+00 : f32
    %240 = vector.broadcast %cst_81 : f32 to vector<8x128xf32>
    %241 = arith.addf %239, %240 : vector<8x128xf32>
    %cst_82 = arith.constant 1.000000e+00 : f32
    %242 = vector.broadcast %cst_82 : f32 to vector<8x128xf32>
    %243 = arith.addf %241, %242 : vector<8x128xf32>
    %cst_83 = arith.constant 5.000000e-01 : f32
    %244 = vector.broadcast %cst_83 : f32 to vector<8x128xf32>
    %245 = arith.mulf %244, %230 : vector<8x128xf32>
    %cst_84 = arith.constant 2.500000e-01 : f32
    %246 = vector.broadcast %cst_84 : f32 to vector<8x128xf32>
    %247 = arith.addf %246, %245 : vector<8x128xf32>
    %cst_85 = arith.constant 1.000000e+00 : f32
    %248 = vector.broadcast %cst_85 : f32 to vector<8x128xf32>
    %249 = arith.mulf %248, %247 : vector<8x128xf32>
    %cst_86 = arith.constant 1.000000e+00 : f32
    %250 = vector.broadcast %cst_86 : f32 to vector<8x128xf32>
    %251 = arith.addf %249, %250 : vector<8x128xf32>
    %252 = arith.addf %220, %223 : vector<8x128xf32>
    %cst_87 = arith.constant 1.57079637 : f32
    %253 = vector.broadcast %cst_87 : f32 to vector<8x128xf32>
    %254 = arith.subf %252, %253 : vector<8x128xf32>
    %255 = math.cos %254 : vector<8x128xf32>
    %cst_88 = arith.constant 4.900000e+00 : f32
    %256 = vector.broadcast %cst_88 : f32 to vector<8x128xf32>
    %257 = arith.mulf %256, %255 : vector<8x128xf32>
    %cst_89 = arith.constant -5.000000e-01 : f32
    %258 = vector.broadcast %cst_89 : f32 to vector<8x128xf32>
    %259 = arith.mulf %258, %229 : vector<8x128xf32>
    %260 = arith.mulf %259, %229 : vector<8x128xf32>
    %261 = arith.mulf %260, %231 : vector<8x128xf32>
    %cst_90 = arith.constant 1.000000e+00 : f32
    %262 = vector.broadcast %cst_90 : f32 to vector<8x128xf32>
    %263 = arith.mulf %262, %229 : vector<8x128xf32>
    %264 = arith.mulf %263, %226 : vector<8x128xf32>
    %265 = arith.mulf %264, %231 : vector<8x128xf32>
    %266 = arith.subf %261, %265 : vector<8x128xf32>
    %cst_91 = arith.constant 1.57079637 : f32
    %267 = vector.broadcast %cst_91 : f32 to vector<8x128xf32>
    %268 = arith.subf %220, %267 : vector<8x128xf32>
    %269 = math.cos %268 : vector<8x128xf32>
    %cst_92 = arith.constant 1.470000e+01 : f32
    %270 = vector.broadcast %cst_92 : f32 to vector<8x128xf32>
    %271 = arith.mulf %270, %269 : vector<8x128xf32>
    %272 = arith.addf %266, %271 : vector<8x128xf32>
    %273 = arith.addf %272, %257 : vector<8x128xf32>
    %274 = arith.divf %251, %243 : vector<8x128xf32>
    %275 = arith.mulf %274, %273 : vector<8x128xf32>
    %276 = arith.addf %4, %275 : vector<8x128xf32>
    %cst_93 = arith.constant 5.000000e-01 : f32
    %277 = vector.broadcast %cst_93 : f32 to vector<8x128xf32>
    %278 = arith.mulf %277, %226 : vector<8x128xf32>
    %279 = arith.mulf %278, %226 : vector<8x128xf32>
    %280 = arith.mulf %279, %231 : vector<8x128xf32>
    %281 = arith.subf %276, %280 : vector<8x128xf32>
    %282 = arith.subf %281, %257 : vector<8x128xf32>
    %283 = arith.mulf %251, %251 : vector<8x128xf32>
    %284 = arith.divf %283, %243 : vector<8x128xf32>
    %cst_94 = arith.constant 1.250000e+00 : f32
    %285 = vector.broadcast %cst_94 : f32 to vector<8x128xf32>
    %286 = arith.subf %285, %284 : vector<8x128xf32>
    %287 = arith.divf %282, %286 : vector<8x128xf32>
    %288 = arith.mulf %251, %287 : vector<8x128xf32>
    %289 = arith.addf %288, %273 : vector<8x128xf32>
    %cst_95 = arith.constant 0.000000e+00 : f32
    %290 = vector.broadcast %cst_95 : f32 to vector<8x128xf32>
    %291 = arith.subf %290, %289 : vector<8x128xf32>
    %292 = arith.divf %291, %243 : vector<8x128xf32>
    %cst_96 = arith.constant 2.000000e+00 : f32
    %293 = vector.broadcast %cst_96 : f32 to vector<8x128xf32>
    %294 = arith.mulf %293, %76 : vector<8x128xf32>
    %295 = arith.addf %2, %294 : vector<8x128xf32>
    %cst_97 = arith.constant 2.000000e+00 : f32
    %296 = vector.broadcast %cst_97 : f32 to vector<8x128xf32>
    %297 = arith.mulf %296, %151 : vector<8x128xf32>
    %298 = arith.addf %295, %297 : vector<8x128xf32>
    %299 = arith.addf %298, %226 : vector<8x128xf32>
    %cst_98 = arith.constant 0.0333333351 : f32
    %300 = vector.broadcast %cst_98 : f32 to vector<8x128xf32>
    %301 = arith.mulf %300, %299 : vector<8x128xf32>
    %302 = arith.addf %0, %301 : vector<8x128xf32>
    %cst_99 = arith.constant 2.000000e+00 : f32
    %303 = vector.broadcast %cst_99 : f32 to vector<8x128xf32>
    %304 = arith.mulf %303, %79 : vector<8x128xf32>
    %305 = arith.addf %3, %304 : vector<8x128xf32>
    %cst_100 = arith.constant 2.000000e+00 : f32
    %306 = vector.broadcast %cst_100 : f32 to vector<8x128xf32>
    %307 = arith.mulf %306, %154 : vector<8x128xf32>
    %308 = arith.addf %305, %307 : vector<8x128xf32>
    %309 = arith.addf %308, %229 : vector<8x128xf32>
    %cst_101 = arith.constant 0.0333333351 : f32
    %310 = vector.broadcast %cst_101 : f32 to vector<8x128xf32>
    %311 = arith.mulf %310, %309 : vector<8x128xf32>
    %312 = arith.addf %1, %311 : vector<8x128xf32>
    %cst_102 = arith.constant 2.000000e+00 : f32
    %313 = vector.broadcast %cst_102 : f32 to vector<8x128xf32>
    %314 = arith.mulf %313, %142 : vector<8x128xf32>
    %315 = arith.addf %67, %314 : vector<8x128xf32>
    %cst_103 = arith.constant 2.000000e+00 : f32
    %316 = vector.broadcast %cst_103 : f32 to vector<8x128xf32>
    %317 = arith.mulf %316, %217 : vector<8x128xf32>
    %318 = arith.addf %315, %317 : vector<8x128xf32>
    %319 = arith.addf %318, %292 : vector<8x128xf32>
    %cst_104 = arith.constant 0.0333333351 : f32
    %320 = vector.broadcast %cst_104 : f32 to vector<8x128xf32>
    %321 = arith.mulf %320, %319 : vector<8x128xf32>
    %322 = arith.addf %2, %321 : vector<8x128xf32>
    %cst_105 = arith.constant 2.000000e+00 : f32
    %323 = vector.broadcast %cst_105 : f32 to vector<8x128xf32>
    %324 = arith.mulf %323, %137 : vector<8x128xf32>
    %325 = arith.addf %62, %324 : vector<8x128xf32>
    %cst_106 = arith.constant 2.000000e+00 : f32
    %326 = vector.broadcast %cst_106 : f32 to vector<8x128xf32>
    %327 = arith.mulf %326, %212 : vector<8x128xf32>
    %328 = arith.addf %325, %327 : vector<8x128xf32>
    %329 = arith.addf %328, %287 : vector<8x128xf32>
    %cst_107 = arith.constant 0.0333333351 : f32
    %330 = vector.broadcast %cst_107 : f32 to vector<8x128xf32>
    %331 = arith.mulf %330, %329 : vector<8x128xf32>
    %332 = arith.addf %3, %331 : vector<8x128xf32>
    %cst_108 = arith.constant 3.14159274 : f32
    %333 = vector.broadcast %cst_108 : f32 to vector<8x128xf32>
    %334 = arith.cmpf ogt, %302, %333 : vector<8x128xf32>
    %cst_109 = arith.constant 6.28318548 : f32
    %cst_110 = arith.constant 0.000000e+00 : f32
    %335 = vector.broadcast %cst_109 : f32 to vector<8x128xf32>
    %336 = vector.broadcast %cst_110 : f32 to vector<8x128xf32>
    %337 = arith.select %334, %335, %336 : vector<8x128xi1>, vector<8x128xf32>
    %338 = arith.subf %302, %337 : vector<8x128xf32>
    %cst_111 = arith.constant -3.14159274 : f32
    %339 = vector.broadcast %cst_111 : f32 to vector<8x128xf32>
    %340 = arith.cmpf olt, %338, %339 : vector<8x128xf32>
    %cst_112 = arith.constant 6.28318548 : f32
    %cst_113 = arith.constant 0.000000e+00 : f32
    %341 = vector.broadcast %cst_112 : f32 to vector<8x128xf32>
    %342 = vector.broadcast %cst_113 : f32 to vector<8x128xf32>
    %343 = arith.select %340, %341, %342 : vector<8x128xi1>, vector<8x128xf32>
    %344 = arith.addf %338, %343 : vector<8x128xf32>
    %c0_114 = arith.constant 0 : index
    %c0_115 = arith.constant 0 : index
    %345 = vector.load %arg6[%c0_114, %c0_115] : memref<8x128xf32, #tpu.memory_space<vmem>>, vector<8x128xf32>
    tpu.vector_store %arg6[%c0_114, %c0_115], %344 {strides = array<i32>} : memref<8x128xf32, #tpu.memory_space<vmem>>, vector<8x128xf32>,
    %cst_116 = arith.constant 3.14159274 : f32
    %346 = vector.broadcast %cst_116 : f32 to vector<8x128xf32>
    %347 = arith.cmpf ogt, %312, %346 : vector<8x128xf32>
    %cst_117 = arith.constant 6.28318548 : f32
    %cst_118 = arith.constant 0.000000e+00 : f32
    %348 = vector.broadcast %cst_117 : f32 to vector<8x128xf32>
    %349 = vector.broadcast %cst_118 : f32 to vector<8x128xf32>
    %350 = arith.select %347, %348, %349 : vector<8x128xi1>, vector<8x128xf32>
    %351 = arith.subf %312, %350 : vector<8x128xf32>
    %cst_119 = arith.constant -3.14159274 : f32
    %352 = vector.broadcast %cst_119 : f32 to vector<8x128xf32>
    %353 = arith.cmpf olt, %351, %352 : vector<8x128xf32>
    %cst_120 = arith.constant 6.28318548 : f32
    %cst_121 = arith.constant 0.000000e+00 : f32
    %354 = vector.broadcast %cst_120 : f32 to vector<8x128xf32>
    %355 = vector.broadcast %cst_121 : f32 to vector<8x128xf32>
    %356 = arith.select %353, %354, %355 : vector<8x128xi1>, vector<8x128xf32>
    %357 = arith.addf %351, %356 : vector<8x128xf32>
    %c0_122 = arith.constant 0 : index
    %c0_123 = arith.constant 0 : index
    %358 = vector.load %arg7[%c0_122, %c0_123] : memref<8x128xf32, #tpu.memory_space<vmem>>, vector<8x128xf32>
    tpu.vector_store %arg7[%c0_122, %c0_123], %357 {strides = array<i32>} : memref<8x128xf32, #tpu.memory_space<vmem>>, vector<8x128xf32>,
    %cst_124 = arith.constant -12.566371 : f32
    %cst_125 = arith.constant 12.566371 : f32
    %359 = vector.broadcast %cst_124 : f32 to vector<8x128xf32>
    %360 = arith.maximumf %359, %322 : vector<8x128xf32>
    %361 = vector.broadcast %cst_125 : f32 to vector<8x128xf32>
    %362 = arith.minimumf %361, %360 : vector<8x128xf32>
    %c0_126 = arith.constant 0 : index
    %c0_127 = arith.constant 0 : index
    %363 = vector.load %arg8[%c0_126, %c0_127] : memref<8x128xf32, #tpu.memory_space<vmem>>, vector<8x128xf32>
    tpu.vector_store %arg8[%c0_126, %c0_127], %362 {strides = array<i32>} : memref<8x128xf32, #tpu.memory_space<vmem>>, vector<8x128xf32>,
    %cst_128 = arith.constant -28.274334 : f32
    %cst_129 = arith.constant 28.274334 : f32
    %364 = vector.broadcast %cst_128 : f32 to vector<8x128xf32>
    %365 = arith.maximumf %364, %332 : vector<8x128xf32>
    %366 = vector.broadcast %cst_129 : f32 to vector<8x128xf32>
    %367 = arith.minimumf %366, %365 : vector<8x128xf32>
    %c0_130 = arith.constant 0 : index
    %c0_131 = arith.constant 0 : index
    %368 = vector.load %arg9[%c0_130, %c0_131] : memref<8x128xf32, #tpu.memory_space<vmem>>, vector<8x128xf32>
    tpu.vector_store %arg9[%c0_130, %c0_131], %367 {strides = array<i32>} : memref<8x128xf32, #tpu.memory_space<vmem>>, vector<8x128xf32>,
    return
  }
  func.func @transform_0(%arg0: i32) -> (i32, i32) {
    %c0_i32 = arith.constant 0 : i32
    %c0_i32_0 = arith.constant 0 : i32
    return %arg0, %c0_i32 : i32, i32
  }
  func.func @transform_1(%arg0: i32) -> (i32, i32) {
    %c0_i32 = arith.constant 0 : i32
    %c0_i32_0 = arith.constant 0 : i32
    return %arg0, %c0_i32 : i32, i32
  }
  func.func @transform_2(%arg0: i32) -> (i32, i32) {
    %c0_i32 = arith.constant 0 : i32
    %c0_i32_0 = arith.constant 0 : i32
    return %arg0, %c0_i32 : i32, i32
  }
  func.func @transform_3(%arg0: i32) -> (i32, i32) {
    %c0_i32 = arith.constant 0 : i32
    %c0_i32_0 = arith.constant 0 : i32
    return %arg0, %c0_i32 : i32, i32
  }
  func.func @transform_4(%arg0: i32) -> (i32, i32) {
    %c0_i32 = arith.constant 0 : i32
    %c0_i32_0 = arith.constant 0 : i32
    return %arg0, %c0_i32 : i32, i32
  }
  func.func @transform_5(%arg0: i32) -> (i32, i32) {
    %c0_i32 = arith.constant 0 : i32
    %c0_i32_0 = arith.constant 0 : i32
    return %arg0, %c0_i32 : i32, i32
  }
  func.func @transform_6(%arg0: i32) -> (i32, i32) {
    %c0_i32 = arith.constant 0 : i32
    %c0_i32_0 = arith.constant 0 : i32
    return %arg0, %c0_i32 : i32, i32
  }
  func.func @transform_7(%arg0: i32) -> (i32, i32) {
    %c0_i32 = arith.constant 0 : i32
    %c0_i32_0 = arith.constant 0 : i32
    return %arg0, %c0_i32 : i32, i32
  }
  func.func @transform_8(%arg0: i32) -> (i32, i32) {
    %c0_i32 = arith.constant 0 : i32
    %c0_i32_0 = arith.constant 0 : i32
    return %arg0, %c0_i32 : i32, i32
  }
}

</mosaic_0001>

<bundles_post_ra>
// kernel: tpu_custom_call.1
= control target key start
LH: loop header
LB: loop body
LE: loop exit
PB: predicated region body
PF: predicated region fallthrough
CT: control target
= control target key end

     0   :  { %14 = vsyncpa [#allocation3], 0  ;;  %s3891_s0 = inlined_call_operand.hbm [shape: f32[8,128], index: 0, kind: input, shape index: {}, may-alias: {0,5}]   ;;  %s3892_s1 = inlined_call_operand.hbm [shape: f32[8,128], index: 1, kind: input, shape index: {}, may-alias: {1,6}]   ;;  %s3893_s2 = inlined_call_operand.hbm [shape: f32[8,128], index: 2, kind: input, shape index: {}, may-alias: {2,7}]   ;;  %s3894_s3 = inlined_call_operand.hbm [shape: f32[8,128], index: 3, kind: input, shape index: {}, may-alias: {3,8}]   ;;  %s3895_s4 = inlined_call_operand.vmem [shape: f32[8,128], index: 4, kind: input, shape index: {}]   ;;  %s3896_s5 = inlined_call_operand.hbm [shape: f32[8,128], index: 5, kind: output, shape index: {0}, may-alias: {0,5}]   ;;  %s3897_s6 = inlined_call_operand.hbm [shape: f32[8,128], index: 6, kind: output, shape index: {1}, may-alias: {1,6}]   ;;  %s3898_s7 = inlined_call_operand.hbm [shape: f32[8,128], index: 7, kind: output, shape index: {2}, may-alias: {2,7}]   ;;  %s3899_s8 = inlined_call_operand.hbm [shape: f32[8,128], index: 8, kind: output, shape index: {3}, may-alias: {3,8}]  }
   0x1   :  { %15 = vsyncpa [#allocation6], 0 }
   0x2   :  { %16 = vsyncpa [#allocation9], 0 }
   0x3   :  { %17 = vsyncpa [#allocation4], 0 }
   0x4   :  { %18 = vsyncpa [#allocation12], 0 }
   0x5   :  { %19 = vsyncpa [#allocation15], 0  ;;  %s2395_s27 = smov [#allocation5]   ;;  %s2396_s29 = smov [#allocation2]  }
   0x6   :  { %s36_s28 = sshll.u32 %s2395_s27, 4  ;;  %s26_s30 = sshll.u32 %s2396_s29, 4  ;;  %s37_s28 = int_to_ptr.vmem [resolvable:$true] %s36_s28  ;;  %s27_s30 = int_to_ptr.vmem [resolvable:$true] %s26_s30 }
   0x7   :  { %s2231_s9 = scalar_lea.vmem %s37_s28, 128  ;;  %p2236_p1 = scmp.lt.s32.totalorder %s37_s28, %s37_s28 }
   0x8   :  { %p2232_p0 = scmp.ne.s32.totalorder %s37_s28, %s2231_s9  ;;  %p2237_p2 = scmp.lt.s32.totalorder %s2231_s9, %s2231_s9 }
   0xa   :  { %p2238_p3 = por %p2237_p2, %p2236_p1 }
   0xc   :  { %p2239_p4 = pnand %p2238_p3, %p2232_p0 }
   0xe   :  { %2242 = shalt.err (!%p2239_p4)
}
   0xf   :  { %39 = dma.hbm_to_vmem [thread:$0]  %s3892_s1, 128, %s37_s28, [#allocation6]  }
  0x10   :  { %s2251_s12 = scalar_lea.vmem %s27_s30, 128  ;;  %p2256_p6 = scmp.lt.s32.totalorder %s27_s30, %s27_s30 }
  0x11   :  { %p2252_p5 = scmp.ne.s32.totalorder %s27_s30, %s2251_s12  ;;  %p2257_p7 = scmp.lt.s32.totalorder %s2251_s12, %s2251_s12 }
  0x13   :  { %p2258_p8 = por %p2257_p7, %p2256_p6 }
  0x15   :  { %p2259_p9 = pnand %p2258_p8, %p2252_p5 }
  0x17   :  { %2262 = shalt.err (!%p2259_p9)
}
  0x18   :  { %29 = dma.hbm_to_vmem [thread:$0]  %s3891_s0, 128, %s27_s30, [#allocation3]  }
  0x19   :  { %s2397_s15 = smov [#allocation7]   ;;  %s2398_s17 = smov [#allocation8]  }
  0x1a   :  { %s46_s16 = sshll.u32 %s2397_s15, 4  ;;  %s56_s18 = sshll.u32 %s2398_s17, 4  ;;  %s47_s16 = int_to_ptr.vmem [resolvable:$true] %s46_s16  ;;  %s57_s18 = int_to_ptr.vmem [resolvable:$true] %s56_s18 }
  0x1b   :  { %s2271_s19 = scalar_lea.vmem %s47_s16, 128  ;;  %p2276_p11 = scmp.lt.s32.totalorder %s47_s16, %s47_s16 }
  0x1c   :  { %p2272_p10 = scmp.ne.s32.totalorder %s47_s16, %s2271_s19  ;;  %p2277_p12 = scmp.lt.s32.totalorder %s2271_s19, %s2271_s19 }
  0x1e   :  { %p2278_p13 = por %p2277_p12, %p2276_p11 }
  0x20   :  { %p2279_p0 = pnand %p2278_p13, %p2272_p10 }
  0x22   :  { %2282 = shalt.err (!%p2279_p0)
}
  0x23   :  { %49 = dma.hbm_to_vmem [thread:$0]  %s3893_s2, 128, %s47_s16, [#allocation6]  }
  0x24   :  { %s2291_s21 = scalar_lea.vmem %s57_s18, 128  ;;  %p2296_p2 = scmp.lt.s32.totalorder %s57_s18, %s57_s18 }
  0x25   :  { %p2292_p1 = scmp.ne.s32.totalorder %s57_s18, %s2291_s21  ;;  %p2297_p3 = scmp.lt.s32.totalorder %s2291_s21, %s2291_s21 }
  0x27   :  { %p2298_p4 = por %p2297_p3, %p2296_p2 }
  0x29   :  { %p2299_p5 = pnand %p2298_p4, %p2292_p1 }
  0x2b   :  { %2302 = shalt.err (!%p2299_p5)
}
  0x2c   :  { %59 = dma.hbm_to_vmem [thread:$0]  %s3894_s3, 128, %s57_s18, [#allocation9]  }
  0x2d   :  { %2383 = dma.done.wait [#allocation3], 128  }
  0x2e   :  { %2384 = vsyncadd [#allocation3], 4294967168 }
  0x2f   :  { %2385 = dma.done.wait [#allocation6], 256  }
  0x30   :  { %2386 = vsyncadd [#allocation6], 4294967040 }
  0x31   :  { %2387 = dma.done.wait [#allocation9], 128  }
  0x32   :  { %2388 = vsyncadd [#allocation9], 4294967168  ;;  %v2467_v0 = vld [vmem:[#allocation2] sm:$0xff]  ;;  %v2469_v1 = vld [vmem:[#allocation5] sm:$0xff]  ;;  %v2399_v27 = vmov 683565275  }
  0x33   :  { %v79_v2 = vand.u32 2147483647, %v2469_v1  ;;  %v82_v3 = vand.u32 2139095040, %v2469_v1  ;;  %v293_v4 = vadd.f32 %v2469_v1, %v2467_v0  ;;  %v2476_v5 = vadd.f32 -1.5707964, %v2467_v0 }
  0x34   :  { %v2400_v29 = vmov 2475754826   ;;  %v2401_v31 = vmov 2131351028   ;;  %v2402_v33 = vmov 2102212464  }
  0x35   :  { %v83_v6 = vshrl.u32 %v82_v3, 23  ;;  %v86_v7 = vand.u32 8388607, %v79_v2  ;;  %v2480_v8 = vadd.f32 -1.5707964, %v293_v4  ;;  %v409_v10 = vand.u32 2139095040, %v2476_v5 }
  0x36   :  { %v2403_v35 = vmov 920167782   ;;  %v2404_v43 = vmov 1326507024  }
  0x37   :  { %v2013_v9 = vadd.s32 4294967169, %v83_v6  ;;  %v295_v11 = vand.u32 2147483647, %v2480_v8  ;;  %v298_v12 = vand.u32 2139095040, %v2480_v8  ;;  %v410_v14 = vshrl.u32 %v409_v10, 23 }
  0x38   :  { %v87_v15 = vor.u32 8388608, %v86_v7 }
  0x39   :  { %v89_v13 = vadd.s32 1, %v2013_v9  ;;  %v299_v16 = vshrl.u32 %v298_v12, 23  ;;  %v302_v17 = vand.u32 8388607, %v295_v11  ;;  %v2027_v20 = vadd.s32 4294967169, %v410_v14 }
  0x3a   :  { %v2487_v23 = vshll.u32 %v87_v15, 8 }
  0x3b   :  { %vm90_vm0 = vcmp.gt.s32.totalorder %v89_v13, 0  ;;  %v2022_v19 = vadd.s32 4294967169, %v299_v16  ;;  %v303_v24 = vor.u32 8388608, %v302_v17  ;;  %v2494_v37 = vadd.s32 1, %v2027_v20 }
  0x3c   :  { %v91_v18 = vsel %vm90_vm0, %v89_v13, 0 }
  0x3d   :  { %v92_v21 = vshrl.u32 %v91_v18, 5  ;;  %v93_v22 = vand.u32 31, %v91_v18  ;;  %v305_v25 = vadd.s32 1, %v2022_v19  ;;  %v2505_v58 = vshll.u32 %v303_v24, 8 }
  0x3e   :  { %vm417_vm6 = vcmp.gt.s32.totalorder %v2494_v37, 0 }
  0x3f   :  { %v94_v26 = vsub.s32 32, %v93_v22  ;;  %v96_v28 = vshll.u32 %v2399_v27, %v93_v22  ;;  %v99_v30 = vshll.u32 %v2400_v29, %v93_v22  ;;  %v102_v32 = vshll.u32 %v2401_v31, %v93_v22 }
  0x40   :  { %v105_v34 = vshll.u32 %v2402_v33, %v93_v22  ;;  %v108_v36 = vshll.u32 %v2403_v35, %v93_v22  ;;  %vm111_vm1 = vcmp.lt.s32.totalorder %v92_v21, 1  ;;  %vm112_vm2 = vcmp.lt.s32.totalorder %v92_v21, 2 }
  0x41   :  { %v95_v38 = vshrl.u32 %v2399_v27, %v94_v26  ;;  %v97_v39 = vshrl.u32 %v2400_v29, %v94_v26  ;;  %v100_v40 = vshrl.u32 %v2401_v31, %v94_v26  ;;  %v103_v41 = vshrl.u32 %v2402_v33, %v94_v26 }
  0x42   :  { %v106_v42 = vshrl.u32 %v2403_v35, %v94_v26  ;;  %v109_v44 = vshrl.u32 %v2404_v43, %v94_v26  ;;  %vm114_vm3 = vcmp.lt.s32.totalorder %v92_v21, 4  ;;  %vm306_vm4 = vcmp.gt.s32.totalorder %v305_v25, 0 }
  0x43   :  { %v98_v45 = vor.u32 %v97_v39, %v96_v28  ;;  %v101_v46 = vor.u32 %v100_v40, %v99_v30  ;;  %v104_v47 = vor.u32 %v103_v41, %v102_v32  ;;  %vm113_vm5 = vcmp.lt.s32.totalorder %v92_v21, 3 }
  0x44   :  { %v107_v48 = vor.u32 %v106_v42, %v105_v34  ;;  %v110_v49 = vor.u32 %v109_v44, %v108_v36  ;;  %v307_v50 = vsel %vm306_vm4, %v305_v25, 0  ;;  %vm2636_vm4 = vcmp.le.f32.partialorder %v79_v2, 0.7853982 }
  0x45   :  { %v115_v51 = vsel %vm111_vm1, %v95_v38, %v98_v45  ;;  %v116_v52 = vsel %vm114_vm3, %v104_v47, 2102212464  ;;  %v119_v53 = vsel %vm111_vm1, %v98_v45, %v101_v46  ;;  %v123_v54 = vsel %vm111_vm1, %v101_v46, %v104_v47 }
  0x46   :  { %v117_v55 = vsel %vm113_vm5, %v101_v46, %v116_v52  ;;  %v120_v56 = vsel %vm114_vm3, %v107_v48, 920167782  ;;  %v124_v57 = vsel %vm114_vm3, %v110_v49, 1326507024  ;;  %v308_v61 = vshrl.u32 %v307_v50, 5 }
  0x47   :  { %v121_v59 = vsel %vm113_vm5, %v104_v47, %v120_v56  ;;  %v125_v60 = vsel %vm113_vm5, %v107_v48, %v124_v57  ;;  %v309_v62 = vand.u32 31, %v307_v50  ;;  %v118_v63 = vsel %vm112_vm2, %v115_v51, %v117_v55 }
  0x48   :  { %v122_v3 = vsel %vm112_vm2, %v119_v53, %v121_v59  ;;  %v126_v4 = vsel %vm112_vm2, %v123_v54, %v125_v60  ;;  %v134_v16 = vmul.u32 %v2487_v23, %v118_v63  ;;  %vm327_vm7 = vcmp.lt.s32.totalorder %v308_v61, 1 }
  0x49   :  { %v2512_v6 = vmul.u32.u64.low %v2487_v23, %v126_v4  ;;  %v2513_v7 = vmul.u32.u64.high %v2487_v23, %v126_v4, %v2512_v6  ;;  %v2516_v9 = vmul.u32.u64.low %v2487_v23, %v122_v3  ;;  %v2517_v10 = vmul.u32.u64.high %v2487_v23, %v122_v3, %v2516_v9  ;;  %v2562_v3 = vld [vmem:[#allocation8] sm:$0xff] }
  0x4a   :  { %v310_v12 = vsub.s32 32, %v309_v62  ;;  %v312_v13 = vshll.u32 %v2399_v27, %v309_v62  ;;  %v315_v14 = vshll.u32 %v2400_v29, %v309_v62  ;;  %v318_v15 = vshll.u32 %v2401_v31, %v309_v62 }
  0x4b   :  { %v321_v17 = vshll.u32 %v2402_v33, %v309_v62  ;;  %v324_v18 = vshll.u32 %v2403_v35, %v309_v62  ;;  %vm136_vm8 = vc.u32 %v2513_v7, %v2516_v9  ;;  %v137_v24 = vadd.s32 1, %v2517_v10 }
  0x4c   :  { %v311_v19 = vshrl.u32 %v2399_v27, %v310_v12  ;;  %v313_v20 = vshrl.u32 %v2400_v29, %v310_v12  ;;  %v316_v21 = vshrl.u32 %v2401_v31, %v310_v12  ;;  %v319_v22 = vshrl.u32 %v2402_v33, %v310_v12 }
  0x4d   :  { %v322_v23 = vshrl.u32 %v2403_v35, %v310_v12  ;;  %vm328_vm9 = vcmp.lt.s32.totalorder %v308_v61, 2  ;;  %v325_v30 = vshrl.u32 %v2404_v43, %v310_v12  ;;  %v138_v32 = vsel %vm136_vm8, %v137_v24, %v2517_v10 }
  0x4e   :  { %v314_v25 = vor.u32 %v313_v20, %v312_v13  ;;  %v317_v26 = vor.u32 %v316_v21, %v315_v14  ;;  %v320_v28 = vor.u32 %v319_v22, %v318_v15  ;;  %vm329_vm10 = vcmp.lt.s32.totalorder %v308_v61, 3 }
  0x4f   :  { %v323_v34 = vor.u32 %v322_v23, %v321_v17  ;;  %vm330_vm11 = vcmp.lt.s32.totalorder %v308_v61, 4  ;;  %v139_v36 = vadd.s32 %v138_v32, %v134_v16  ;;  %v326_v38 = vor.u32 %v325_v30, %v324_v18 }
  0x50   :  { %v331_v39 = vsel %vm327_vm7, %v311_v19, %v314_v25  ;;  %v332_v40 = vsel %vm330_vm11, %v320_v28, 2102212464  ;;  %v335_v42 = vsel %vm327_vm7, %v314_v25, %v317_v26  ;;  %v339_v45 = vsel %vm327_vm7, %v317_v26, %v320_v28 }
  0x51   :  { %v333_v41 = vsel %vm329_vm10, %v317_v26, %v332_v40  ;;  %v336_v44 = vsel %vm330_vm11, %v323_v34, 920167782  ;;  %v140_v46 = vadd.s32 536870912, %v139_v36  ;;  %v340_v48 = vsel %vm330_vm11, %v326_v38, 1326507024 }
  0x52   :  { %v337_v47 = vsel %vm329_vm10, %v320_v28, %v336_v44  ;;  %v418_v49 = vsel %vm417_vm6, %v2494_v37, 0  ;;  %v334_v50 = vsel %vm328_vm9, %v331_v39, %v333_v41  ;;  %v341_v52 = vsel %vm329_vm10, %v323_v34, %v340_v48 }
  0x53   :  { %v338_v51 = vsel %vm328_vm9, %v335_v42, %v337_v47  ;;  %v2547_v53 = vshrl.u32 %v140_v46, 30  ;;  %v342_v54 = vsel %vm328_vm9, %v339_v45, %v341_v52  ;;  %v420_v37 = vand.u32 31, %v418_v49 }
  0x54   :  { %v2551_v55 = vmul.u32.u64.low %v2505_v58, %v338_v51  ;;  %v2552_v56 = vmul.u32.u64.high %v2505_v58, %v338_v51, %v2551_v55  ;;  %v2556_v57 = vmul.u32.u64.low %v2505_v58, %v342_v54  ;;  %v2557_v59 = vmul.u32.u64.high %v2505_v58, %v342_v54, %v2556_v57 }
  0x55   :  { %v142_v60 = vshll.u32 %v2547_v53, 30  ;;  %v406_v62 = vand.u32 2147483647, %v2476_v5  ;;  %v350_v63 = vmul.u32 %v2505_v58, %v334_v50  ;;  %v421_v6 = vsub.s32 32, %v420_v37 }
  0x56   :  { %v353_v4 = vadd.s32 1, %v2552_v56  ;;  %vm352_vm12 = vc.u32 %v2557_v59, %v2551_v55  ;;  %v2570_v15 = vshrl.u32 %v418_v49, 5  ;;  %v423_v58 = vshll.u32 %v2399_v27, %v420_v37 }
  0x57   :  { %v143_v61 = vsub.s32 %v139_v36, %v142_v60  ;;  %v413_v13 = vand.u32 8388607, %v406_v62  ;;  %v532_v16 = vmul.f32 0.1, %v2562_v3  ;;  %v424_v18 = vshrl.u32 %v2400_v29, %v421_v6 }
  0x58   :  { %v354_v12 = vsel %vm352_vm12, %v353_v4, %v2552_v56  ;;  %v426_v19 = vshll.u32 %v2400_v29, %v420_v37  ;;  %v429_v20 = vshll.u32 %v2401_v31, %v420_v37  ;;  %v427_v22 = vshrl.u32 %v2401_v31, %v421_v6 }
  0x59   :  { %v145_v10 = vsub.s32 0, %v143_v61  ;;  %v355_v14 = vadd.s32 %v354_v12, %v350_v63  ;;  %v430_v24 = vshrl.u32 %v2402_v33, %v421_v6  ;;  %v432_v23 = vshll.u32 %v2402_v33, %v420_v37 }
  0x5a   :  { %v433_v26 = vshrl.u32 %v2403_v35, %v421_v6  ;;  %v435_v28 = vshll.u32 %v2403_v35, %v420_v37  ;;  %v135_v30 = vadd.s32 %v2516_v9, %v2513_v7  ;;  %v414_v34 = vor.u32 8388608, %v413_v13 }
  0x5b   :  { %v2014_v17 = vmin.u32 %v145_v10, %v143_v61  ;;  %v356_v21 = vadd.s32 536870912, %v355_v14  ;;  %v2587_v36 = vadd.f32 %v532_v16, %v2469_v1  ;;  %v425_v39 = vor.u32 %v424_v18, %v423_v58 }
  0x5c   :  { %v436_v40 = vshrl.u32 %v2404_v43, %v421_v6  ;;  %vm438_vm13 = vcmp.lt.s32.totalorder %v2570_v15, 1  ;;  %v428_v42 = vor.u32 %v427_v22, %v426_v19  ;;  %v431_v44 = vor.u32 %v430_v24, %v429_v20  ;;  %v2619_v22 = vld [vmem:[#allocation7] sm:$0xff] }
  0x5d   :  { %v147_v25 = vclz %v2014_v17  ;;  %v2584_v32 = vshrl.u32 %v356_v21, 30  ;;  %v434_v45 = vor.u32 %v433_v26, %v432_v23  ;;  %vm439_vm15 = vcmp.lt.s32.totalorder %v2570_v15, 2 }
  0x5e   :  { %v437_v46 = vor.u32 %v436_v40, %v435_v28  ;;  %vm441_vm0 = vcmp.lt.s32.totalorder %v2570_v15, 4  ;;  %v422_v47 = vshrl.u32 %v2399_v27, %v421_v6  ;;  %vm440_vm1 = vcmp.lt.s32.totalorder %v2570_v15, 3 }
  0x5f   :  { %v2015_v38 = vadd.s32 4294967294, %v147_v25  ;;  %v358_v41 = vshll.u32 %v2584_v32, 30  ;;  %v443_v51 = vsel %vm441_vm0, %v431_v44, 2102212464  ;;  %v446_v54 = vsel %vm438_vm13, %v425_v39, %v428_v42 }
  0x60   :  { %v447_v56 = vsel %vm441_vm0, %v434_v45, 920167782  ;;  %v450_v57 = vsel %vm438_vm13, %v428_v42, %v431_v44  ;;  %v442_v6 = vsel %vm438_vm13, %v422_v47, %v425_v39  ;;  %v444_v13 = vsel %vm440_vm1, %v428_v42, %v443_v51 }
  0x61   :  { %vm2016_vm14 = vcmp.lt.s32.totalorder %v2015_v38, 0  ;;  %v359_v9 = vsub.s32 %v355_v14, %v358_v41  ;;  %v448_v63 = vsel %vm440_vm1, %v431_v44, %v447_v56  ;;  %v454_v18 = vshll.u32 %v414_v34, 8 }
  0x62   :  { %v150_v7 = vsel %vm2016_vm14, 0, %v2015_v38  ;;  %v449_v16 = vsel %vm439_vm15, %v446_v54, %v448_v63  ;;  %v541_v21 = vand.u32 2139095040, %v2587_v36  ;;  %vm81_vm2 = vcmp.lt.s32.totalorder %v2469_v1, 0 }
  0x63   :  { %v151_v48 = vsub.s32 32, %v150_v7  ;;  %v152_v49 = vshll.u32 %v143_v61, %v150_v7  ;;  %v155_v50 = vsub.s32 4294967266, %v150_v7  ;;  %v361_v52 = vsub.s32 0, %v359_v9 }
  0x64   :  { %v451_v61 = vsel %vm441_vm0, %v437_v46, 1326507024  ;;  %v445_v28 = vsel %vm439_vm15, %v442_v6, %v444_v13  ;;  %v165_v34 = vsub.s32 4, %v2547_v53  ;;  %v351_v39 = vadd.s32 %v2551_v55, %v2557_v59 }
  0x65   :  { %v153_v37 = vshrl.u32 %v135_v30, %v151_v48  ;;  %v156_v60 = vadd.s32 127, %v155_v50  ;;  %v2023_v4 = vmin.u32 %v361_v52, %v359_v9  ;;  %v452_v14 = vsel %vm440_vm1, %v434_v45, %v451_v61 }
  0x66   :  { %v453_v17 = vsel %vm439_vm15, %v450_v57, %v452_v14  ;;  %v2627_v30 = vmul.u32.u64.low %v454_v18, %v449_v16  ;;  %v2628_v38 = vmul.u32.u64.high %v454_v18, %v449_v16, %v2627_v30  ;;  %v542_v40 = vshrl.u32 %v541_v21, 23 }
  0x67   :  { %v154_v10 = vor.u32 %v153_v37, %v152_v49  ;;  %v157_v12 = vshll.u32 %v156_v60, 23  ;;  %v363_v58 = vclz %v2023_v4  ;;  %v530_v44 = vmul.f32 0.1, %v2619_v22 }
  0x68   :  { %v2622_v23 = vmul.u32.u64.low %v454_v18, %v453_v17  ;;  %v2623_v25 = vmul.u32.u64.high %v454_v18, %v453_v17, %v2622_v23  ;;  %v461_v47 = vmul.u32 %v454_v18, %v445_v28  ;;  %v464_v55 = vadd.s32 1, %v2628_v38 }
  0x69   :  { %v158_v19 = vor.u32 4788187, %v157_v12  ;;  %v161_v20 = vcvt.s32.f32 %v154_v10  ;;  %v2024_v24 = vadd.s32 4294967294, %v363_v58  ;;  %v2031_v59 = vadd.s32 4294967169, %v542_v40 }
  0x6a   :  { %vm463_vm5 = vc.u32 %v2623_v25, %v2627_v30  ;;  %v166_v2 = vsel %vm81_vm2, %v165_v34, %v2547_v53  ;;  %v2651_v52 = vadd.f32 %v530_v44, %v2467_v0  ;;  %v538_v63 = vand.u32 2147483647, %v2587_v36 }
  0x6b   :  { %v159_v26 = vand.u32 2147483647, %v158_v19  ;;  %vm2025_vm3 = vcmp.lt.s32.totalorder %v2024_v24, 0  ;;  %v548_v54 = vadd.s32 1, %v2031_v59  ;;  %v168_v53 = vsel %vm2636_vm4, 0, %v166_v2 }
  0x6c   :  { %v366_v15 = vsel %vm2025_vm3, 0, %v2024_v24  ;;  %v381_v6 = vsub.s32 4, %v2584_v32  ;;  %v399_v10 = vmul.f32 -0.5, %v2562_v3  ;;  %v2663_v16 = vand.u32 3, %v168_v53 }
  0x6d   :  { %v162_v42 = vmul.f32 %v161_v20, %v159_v26  ;;  %v367_v45 = vsub.s32 32, %v366_v15  ;;  %v368_v46 = vshll.u32 %v359_v9, %v366_v15  ;;  %v371_v7 = vsub.s32 4294967266, %v366_v15 }
  0x6e   :  { %v465_v9 = vsel %vm463_vm5, %v464_v55, %v2628_v38  ;;  %vm549_vm6 = vcmp.gt.s32.totalorder %v548_v54, 0  ;;  %v275_v17 = vadd.s32 3, %v168_v53  ;;  %vm297_vm7 = vcmp.lt.s32.totalorder %v2480_v8, 0 }
  0x6f   :  { %v163_v48 = vxor.u32 2147483648, %v162_v42  ;;  %v369_v49 = vshrl.u32 %v351_v39, %v367_v45  ;;  %v372_v50 = vadd.s32 127, %v371_v7  ;;  %v466_v60 = vadd.s32 %v465_v9, %v461_v47 }
  0x70   :  { %v550_v12 = vsel %vm549_vm6, %v548_v54, 0  ;;  %v545_v20 = vand.u32 8388607, %v538_v63  ;;  %v752_v21 = vadd.f32 %v2587_v36, %v2651_v52  ;;  %v2674_v24 = vsel %vm297_vm7, %v381_v6, %v2584_v32 }
  0x71   :  { %v164_v51 = vsel %vm81_vm2, %v163_v48, %v162_v42  ;;  %v370_v57 = vor.u32 %v369_v49, %v368_v46  ;;  %v373_v37 = vshll.u32 %v372_v50, 23  ;;  %v467_v0 = vadd.s32 536870912, %v466_v60 }
  0x72   :  { %v167_v56 = vsel %vm2636_vm4, %v2469_v1, %v164_v51  ;;  %v552_v58 = vand.u32 31, %v550_v12  ;;  %v2677_v23 = vmul.f32 %v399_v10, %v2562_v3  ;;  %v2681_v26 = vmul.f32 %v2562_v3, %v2619_v22 }
  0x73   :  { %2150 = vcosq.f32 %v167_v56  ;;  %v374_v61 = vor.u32 4788187, %v373_v37  ;;  %v377_v4 = vcvt.s32.f32 %v370_v57  ;;  %v2661_v14 = vshrl.u32 %v467_v0, 30 }
  0x74   :  { %2152 = vsinq.f32 %v167_v56  ;;  %v2684_v28 = vmul.f32 0.5, %v2619_v22  ;;  %vm2688_vm8 = vcmp.le.f32.partialorder %v295_v11, 0.7853982  ;;  %v553_v32 = vsub.s32 32, %v552_v58 }
  0x75   :  { %v375_v13 = vand.u32 2147483647, %v374_v61  ;;  %v469_v19 = vshll.u32 %v2661_v14, 30  ;;  %vm171_vm9 = vweird.f32 %v2469_v1  ;;  %vm173_vm10 = vcmp.lt.s32.totalorder %v2663_v16, 2 }
  0x76   :  { %vm174_vm11 = vcmp.eq.s32.totalorder %v2663_v16, 0  ;;  %vm177_vm12 = vcmp.eq.s32.totalorder %v2663_v16, 2  ;;  %v2698_v40 = vand.u32 3, %v275_v17  ;;  %v384_v11 = vsel %vm2688_vm8, 0, %v2674_v24 }
  0x77   :  { %v378_v18 = vmul.f32 %v377_v4, %v375_v13  ;;  %v2692_v39 = vsub.s32 %v466_v60, %v469_v19  ;;  %v546_v42 = vor.u32 8388608, %v545_v20  ;;  %v2704_v15 = vadd.f32 -1.5707964, %v752_v21 }
  0x78   :  { %v462_v44 = vadd.s32 %v2627_v30, %v2623_v25  ;;  %v2708_v45 = vshrl.u32 %v550_v12, 5  ;;  %v555_v46 = vshll.u32 %v2399_v27, %v552_v58  ;;  %v564_v7 = vshll.u32 %v2402_v33, %v552_v58 }
  0x79   :  { %v379_v34 = vxor.u32 2147483648, %v378_v18  ;;  %v472_v41 = vsub.s32 0, %v2692_v39  ;;  %v556_v55 = vshrl.u32 %v2400_v29, %v553_v32  ;;  %v565_v59 = vshrl.u32 %v2403_v35, %v553_v32 }
  0x7a   :  { %vm408_vm13 = vcmp.lt.s32.totalorder %v2476_v5, 0  ;;  %v558_v2 = vshll.u32 %v2400_v29, %v552_v58  ;;  %v559_v25 = vshrl.u32 %v2401_v31, %v553_v32  ;;  %v561_v30 = vshll.u32 %v2401_v31, %v552_v58 }
  0x7b   :  { %v380_v47 = vsel %vm297_vm7, %v379_v34, %v378_v18  ;;  %v2028_v48 = vmin.u32 %v472_v41, %v2692_v39  ;;  %v562_v49 = vshrl.u32 %v2402_v33, %v553_v32  ;;  %vm281_vm14 = vcmp.eq.s32.totalorder %v2698_v40, 2 }
  0x7c   :  { %v492_v9 = vsub.s32 4, %v2661_v14  ;;  %v2724_v54 = vshll.u32 %v546_v42, 8  ;;  %v757_v56 = vand.u32 2139095040, %v2704_v15  ;;  %v383_v60 = vsel %vm2688_vm8, %v2480_v8, %v380_v47 }
  0x7d   :  { %v474_v51 = vclz %v2028_v48  ;;  %v567_v53 = vshll.u32 %v2403_v35, %v552_v58  ;;  %v568_v61 = vshrl.u32 %v2404_v43, %v553_v32  ;;  %vm278_vm15 = vcmp.eq.s32.totalorder %v2698_v40, 0 }
  0x7e   :  { %v557_v6 = vor.u32 %v556_v55, %v555_v46  ;;  %v566_v10 = vor.u32 %v565_v59, %v564_v7  ;;  %v560_v13 = vor.u32 %v559_v25, %v558_v2  ;;  %v563_v17 = vor.u32 %v562_v49, %v561_v30 }
  0x7f   :  { %v2029_v0 = vadd.s32 4294967294, %v474_v51  ;;  %vm573_vm0 = vcmp.lt.s32.totalorder %v2708_v45, 4  ;;  %2154 = vcosq.f32 %v383_v60  ;;  %vm570_vm2 = vcmp.lt.s32.totalorder %v2708_v45, 1 }
  0x80   :  { %v2151_v50 = vpop.eup %2150  ;;  %v569_v20 = vor.u32 %v568_v61, %v567_v53  ;;  %vm572_vm3 = vcmp.lt.s32.totalorder %v2708_v45, 3  ;;  %vm277_vm4 = vcmp.lt.s32.totalorder %v2698_v40, 2  ;;  %v579_v42 = vsel %vm573_vm0, %v566_v10, 920167782 }
  0x81   :  { %v2153_v57 = vpop.eup %2152  ;;  %v178_v37 = vxor.u32 2147483648, %v2151_v50  ;;  %vm2030_vm1 = vcmp.lt.s32.totalorder %v2029_v0, 0  ;;  %2156 = vsinq.f32 %v383_v60  ;;  %v554_v16 = vshrl.u32 %v2399_v27, %v553_v32 }
  0x82   :  { %v175_v4 = vxor.u32 2147483648, %v2153_v57  ;;  %v477_v19 = vsel %vm2030_vm1, 0, %v2029_v0  ;;  %v758_v7 = vshrl.u32 %v757_v56, 23  ;;  %vm2751_vm5 = vcmp.le.f32.partialorder %v406_v62, 0.7853982 }
  0x83   :  { %v179_v12 = vsel %vm177_vm12, %v178_v37, %v2153_v57  ;;  %v478_v34 = vsub.s32 32, %v477_v19  ;;  %v479_v41 = vshll.u32 %v2692_v39, %v477_v19  ;;  %v482_v55 = vsub.s32 4294967266, %v477_v19 }
  0x84   :  { %v176_v18 = vsel %vm174_vm11, %v2151_v50, %v175_v4  ;;  %v493_v39 = vsel %vm408_vm13, %v492_v9, %v2661_v14  ;;  %vm571_vm6 = vcmp.lt.s32.totalorder %v2708_v45, 2  ;;  %v575_v2 = vsel %vm573_vm0, %v563_v17, 2102212464 }
  0x85   :  { %v180_v58 = vsel %vm173_vm10, %v176_v18, %v179_v12  ;;  %v480_v48 = vshrl.u32 %v462_v44, %v478_v34  ;;  %v578_v32 = vsel %vm570_vm2, %v557_v6, %v560_v13  ;;  %v580_v62 = vsel %vm572_vm3, %v563_v17, %v579_v42 }
  0x86   :  { %v181_v21 = vsel %vm171_vm9, nan, %v180_v58  ;;  %v483_v30 = vadd.s32 127, %v482_v55  ;;  %v582_v44 = vsel %vm570_vm2, %v560_v13, %v563_v17  ;;  %v583_v14 = vsel %vm573_vm0, %v569_v20, 1326507024 }
  0x87   :  { %v286_v46 = vadd.f32 1.25, %v181_v21  ;;  %v481_v25 = vor.u32 %v480_v48, %v479_v41  ;;  %v283_v49 = vsel %vm281_vm14, %v178_v37, %v2153_v57  ;;  %v574_v9 = vsel %vm570_vm2, %v554_v16, %v557_v6 }
  0x88   :  { %v584_v56 = vsel %vm572_vm3, %v566_v10, %v583_v14  ;;  %v484_v60 = vshll.u32 %v483_v30, 23  ;;  %v576_v53 = vsel %vm572_vm3, %v560_v13, %v575_v2  ;;  %v581_v61 = vsel %vm571_vm6, %v578_v32, %v580_v62 }
  0x89   :  { %v287_v59 = vadd.f32 0.25, %v286_v46  ;;  %v585_v0 = vsel %vm571_vm6, %v582_v44, %v584_v56  ;;  %v280_v57 = vsel %vm278_vm15, %v2151_v50, %v175_v4  ;;  %v290_v12 = vmul.f32 0.5, %v181_v21 }
  0x8a   :  { %v2040_v17 = vadd.s32 4294967169, %v758_v7  ;;  %v485_v6 = vor.u32 4788187, %v484_v60  ;;  %v488_v18 = vcvt.s32.f32 %v481_v25  ;;  %v2791_v13 = vand.u32 3, %v384_v11 }
  0x8b   :  { %v288_v51 = vadd.f32 1.0, %v287_v59  ;;  %v2784_v10 = vmul.u32.u64.low %v2724_v54, %v585_v0  ;;  %v2785_v58 = vmul.u32.u64.high %v2724_v54, %v585_v0, %v2784_v10  ;;  %v577_v19 = vsel %vm571_vm6, %v574_v9, %v576_v53 }
  0x8c   :  { %v2796_v50 = vmul.u32.u64.low %v2724_v54, %v581_v61  ;;  %v2797_v4 = vmul.u32.u64.high %v2724_v54, %v581_v61, %v2796_v50  ;;  %v486_v20 = vand.u32 2147483647, %v485_v6  ;;  %v754_v21 = vand.u32 2147483647, %v2704_v15  ;;  %v2155_v41 = vpop.eup %2154 }
  0x8d   :  { %v289_v37 = vadd.f32 1.0, %v288_v51  ;;  %v764_v34 = vadd.s32 1, %v2040_v17  ;;  %v284_v38 = vsel %vm277_vm4, %v280_v57, %v283_v49  ;;  %v495_v24 = vsel %vm2751_vm5, 0, %v493_v39 }
  0x8e   :  { %v2807_v11 = vmul.f32 %v2684_v28, %v2619_v22  ;;  %v2810_v45 = vadd.f32 -1.5707964, %v2651_v52  ;;  %v291_v42 = vadd.f32 0.25, %v290_v12  ;;  %v489_v46 = vmul.f32 %v488_v18, %v486_v20  ;;  %v2157_v7 = vpop.eup %2156 }
  0x8f   :  { %2158 = vrcp.f32 %v289_v37  ;;  %v593_v16 = vmul.u32 %v2724_v54, %v577_v19  ;;  %vm595_vm7 = vc.u32 %v2785_v58, %v2796_v50  ;;  %vm390_vm8 = vcmp.eq.s32.totalorder %v2791_v13, 0 }
  0x90   :  { %vm393_vm10 = vcmp.eq.s32.totalorder %v2791_v13, 2  ;;  %v596_v40 = vadd.s32 1, %v2797_v4  ;;  %vm765_vm11 = vcmp.gt.s32.totalorder %v764_v34, 0  ;;  %v490_v28 = vxor.u32 2147483648, %v489_v46 }
  0x91   :  { %v2820_v52 = vand.u32 8388607, %v754_v21  ;;  %v766_v48 = vsel %vm765_vm11, %v764_v34, 0  ;;  %v865_v55 = vand.u32 2147483647, %v2810_v45  ;;  %v2825_v54 = vsel %vm171_vm9, nan, %v284_v38 }
  0x92   :  { %v2827_v39 = vand.u32 3, %v495_v24  ;;  %v597_v59 = vsel %vm595_vm7, %v596_v40, %v2797_v4  ;;  %v768_v2 = vand.u32 31, %v766_v48  ;;  %v2830_v32 = vadd.f32 1.0, %v291_v42 }
  0x93   :  { %vm389_vm12 = vcmp.lt.s32.totalorder %v2791_v13, 2  ;;  %v394_v62 = vxor.u32 2147483648, %v2155_v41  ;;  %v491_v25 = vsel %vm408_vm13, %v490_v28, %v489_v46  ;;  %v598_v30 = vadd.s32 %v597_v59, %v593_v16 }
  0x94   :  { %v391_v44 = vxor.u32 2147483648, %v2157_v7  ;;  %v494_v1 = vsel %vm2751_vm5, %v2476_v5, %v491_v25  ;;  %v769_v14 = vsub.s32 32, %v768_v2  ;;  %v771_v49 = vshll.u32 %v2399_v27, %v768_v2 }
  0x95   :  { %2160 = vcosq.f32 %v494_v1  ;;  %v599_v51 = vadd.s32 536870912, %v598_v30  ;;  %v774_v9 = vshll.u32 %v2400_v29, %v768_v2  ;;  %v777_v56 = vshll.u32 %v2401_v31, %v768_v2 }
  0x96   :  { %2162 = vsinq.f32 %v494_v1  ;;  %v772_v60 = vshrl.u32 %v2400_v29, %v769_v14  ;;  %v775_v53 = vshrl.u32 %v2401_v31, %v769_v14  ;;  %v780_v61 = vshll.u32 %v2402_v33, %v768_v2 }
  0x97   :  { %vm387_vm9 = vweird.f32 %v2480_v8  ;;  %v2845_v47 = vshrl.u32 %v599_v51, 30  ;;  %v767_v0 = vshrl.u32 %v766_v48, 5  ;;  %v778_v57 = vshrl.u32 %v2402_v33, %v769_v14 }
  0x98   :  { %v781_v37 = vshrl.u32 %v2403_v35, %v769_v14  ;;  %v521_v12 = vmul.f32 %v2830_v32, %v2830_v32  ;;  %v783_v17 = vshll.u32 %v2403_v35, %v768_v2  ;;  %v784_v6 = vshrl.u32 %v2404_v43, %v769_v14 }
  0x99   :  { %v868_v18 = vand.u32 2139095040, %v2810_v45  ;;  %v392_v10 = vsel %vm390_vm8, %v2155_v41, %v391_v44  ;;  %v395_v19 = vsel %vm393_vm10, %v394_v62, %v2157_v7  ;;  %v601_v4 = vshll.u32 %v2845_v47, 30 }
  0x9a   :  { %v762_v20 = vor.u32 8388608, %v2820_v52  ;;  %vm504_vm13 = vcmp.eq.s32.totalorder %v2827_v39, 2  ;;  %v773_v38 = vor.u32 %v772_v60, %v771_v49  ;;  %v776_v24 = vor.u32 %v775_v53, %v774_v9 }
  0x9b   :  { %v779_v42 = vor.u32 %v778_v57, %v777_v56  ;;  %v782_v46 = vor.u32 %v781_v37, %v780_v61  ;;  %vm501_vm14 = vcmp.eq.s32.totalorder %v2827_v39, 0  ;;  %v2864_v16 = vsub.s32 %v598_v30, %v601_v4 }
  0x9c   :  { %v2860_v34 = vpop.eup %2158  ;;  %v770_v41 = vshrl.u32 %v2399_v27, %v769_v14  ;;  %vm786_vm15 = vcmp.lt.s32.totalorder %v767_v0, 1  ;;  %vm789_vm0 = vcmp.lt.s32.totalorder %v767_v0, 4  ;;  %v2869_v40 = vmul.f32 %v2677_v23, %v2825_v54 }
  0x9d   :  { %vm500_vm1 = vcmp.lt.s32.totalorder %v2827_v39, 2  ;;  %v785_v7 = vor.u32 %v784_v6, %v783_v17  ;;  %v791_v28 = vsel %vm789_vm0, %v779_v42, 2102212464  ;;  %v869_v52 = vshrl.u32 %v868_v18, 23 }
  0x9e   :  { %v403_v48 = vmul.f32 %v2681_v26, %v2825_v54  ;;  %vm498_vm2 = vweird.f32 %v2476_v5  ;;  %v522_v59 = vmul.f32 %v2860_v34, %v521_v12  ;;  %v604_v2 = vsub.s32 0, %v2864_v16 }
  0x9f   :  { %vm788_vm3 = vcmp.lt.s32.totalorder %v767_v0, 3  ;;  %v396_v23 = vsel %vm389_vm12, %v392_v10, %v395_v19  ;;  %vm787_vm4 = vcmp.lt.s32.totalorder %v767_v0, 2  ;;  %v794_v62 = vsel %vm786_vm15, %v773_v38, %v776_v24 }
  0xa0   :  { %v795_v25 = vsel %vm789_vm0, %v782_v46, 920167782  ;;  %v2032_v30 = vmin.u32 %v604_v2, %v2864_v16  ;;  %v790_v44 = vsel %vm786_vm15, %v770_v41, %v773_v38  ;;  %v792_v26 = vsel %vm788_vm3, %v776_v24, %v791_v28 }
  0xa1   :  { %v802_v1 = vshll.u32 %v762_v20, 8  ;;  %v796_v14 = vsel %vm788_vm3, %v779_v42, %v795_v25  ;;  %v798_v49 = vsel %vm786_vm15, %v776_v24, %v779_v42  ;;  %v799_v51 = vsel %vm789_vm0, %v785_v7, 1326507024 }
  0xa2   :  { %v2045_v13 = vadd.s32 4294967169, %v869_v52  ;;  %v523_v9 = vsub.f32 1.25, %v522_v59  ;;  %v606_v56 = vclz %v2032_v30  ;;  %v797_v60 = vsel %vm787_vm4, %v794_v62, %v796_v14  ;;  %v2161_v61 = vpop.eup %2160 }
  0xa3   :  { %v800_v53 = vsel %vm788_vm3, %v782_v46, %v799_v51  ;;  %v397_v57 = vsel %vm387_vm9, nan, %v396_v23  ;;  %v404_v37 = vsub.f32 %v2869_v40, %v403_v48  ;;  %v793_v12 = vsel %vm787_vm4, %v790_v44, %v792_v26  ;;  %v2163_v6 = vpop.eup %2162 }
  0xa4   :  { %v801_v17 = vsel %vm787_vm4, %v798_v49, %v800_v53  ;;  %v505_v18 = vxor.u32 2147483648, %v2161_v61  ;;  %v2033_v10 = vadd.s32 4294967294, %v606_v56  ;;  %v502_v20 = vxor.u32 2147483648, %v2163_v6 }
  0xa5   :  { %v2895_v19 = vmul.u32.u64.low %v802_v1, %v801_v17  ;;  %v2896_v4 = vmul.u32.u64.high %v802_v1, %v801_v17, %v2895_v19  ;;  %v2898_v38 = vmul.u32.u64.low %v802_v1, %v797_v60  ;;  %v2899_v24 = vmul.u32.u64.high %v802_v1, %v797_v60, %v2898_v38  ;;  %v2927_v60 = vld [vmem:[%s3895_s4] sm:$0xff] }
  0xa6   :  { %v875_v42 = vadd.s32 1, %v2045_v13  ;;  %v506_v8 = vsel %vm504_vm13, %v505_v18, %v2163_v6  ;;  %2164 = vrcp.f32 %v523_v9  ;;  %v594_v0 = vadd.s32 %v2796_v50, %v2785_v58 }
  0xa7   :  { %vm2034_vm5 = vcmp.lt.s32.totalorder %v2033_v10, 0  ;;  %v503_v46 = vsel %vm501_vm14, %v2161_v61, %v502_v20  ;;  %v809_v40 = vmul.u32 %v802_v1, %v793_v12  ;;  %v398_v59 = vmul.f32 4.9, %v397_v57 }
  0xa8   :  { %v609_v41 = vsel %vm2034_vm5, 0, %v2033_v10  ;;  %vm876_vm6 = vcmp.gt.s32.totalorder %v875_v42, 0  ;;  %v507_v7 = vsel %vm500_vm1, %v503_v46, %v506_v8  ;;  %vm811_vm7 = vc.u32 %v2896_v4, %v2898_v38 }
  0xa9   :  { %v610_v28 = vsub.s32 32, %v609_v41  ;;  %v611_v52 = vshll.u32 %v2864_v16, %v609_v41  ;;  %v614_v48 = vsub.s32 4294967266, %v609_v41  ;;  %v508_v2 = vsel %vm498_vm2, nan, %v507_v7 }
  0xaa   :  { %v812_v58 = vadd.s32 1, %v2899_v24  ;;  %v509_v50 = vmul.f32 14.7, %v508_v2  ;;  %v877_v25 = vsel %vm876_vm6, %v875_v42, 0  ;;  %v513_v39 = vmul.f32 %v2860_v34, %v2830_v32 }
  0xab   :  { %v612_v23 = vshrl.u32 %v594_v0, %v610_v28  ;;  %v615_v62 = vadd.s32 127, %v614_v48  ;;  %v872_v16 = vand.u32 8388607, %v865_v55  ;;  %v879_v44 = vand.u32 31, %v877_v25 }
  0xac   :  { %v813_v30 = vsel %vm811_vm7, %v812_v58, %v2899_v24  ;;  %v510_v5 = vadd.f32 %v509_v50, %v404_v37  ;;  %vm540_vm8 = vcmp.lt.s32.totalorder %v2587_v36, 0  ;;  %v518_v53 = vmul.f32 %v2807_v11, %v2825_v54 }
  0xad   :  { %v613_v26 = vor.u32 %v612_v23, %v611_v52  ;;  %v616_v1 = vshll.u32 %v615_v62, 23  ;;  %v814_v14 = vadd.s32 %v813_v30, %v809_v40  ;;  %v880_v49 = vsub.s32 32, %v879_v44 }
  0xae   :  { %v2922_v51 = vadd.f32 %v510_v5, %v398_v59  ;;  %v624_v61 = vsub.s32 4, %v2845_v47  ;;  %v873_v57 = vor.u32 8388608, %v872_v16  ;;  %v2932_v37 = vshrl.u32 %v877_v25, 5 }
  0xaf   :  { %v617_v13 = vor.u32 4788187, %v616_v1  ;;  %v620_v9 = vcvt.s32.f32 %v613_v26  ;;  %v815_v56 = vadd.s32 536870912, %v814_v14  ;;  %v882_v18 = vshll.u32 %v2399_v27, %v879_v44 }
  0xb0   :  { %v514_v12 = vmul.f32 %v513_v39, %v2922_v51  ;;  %v883_v10 = vshrl.u32 %v2400_v29, %v880_v49  ;;  %v885_v19 = vshll.u32 %v2400_v29, %v879_v44  ;;  %v886_v20 = vshrl.u32 %v2401_v31, %v880_v49 }
  0xb1   :  { %v618_v17 = vand.u32 2147483647, %v617_v13  ;;  %v2935_v6 = vshrl.u32 %v815_v56, 30  ;;  %v888_v11 = vshll.u32 %v2401_v31, %v879_v44  ;;  %v889_v8 = vshrl.u32 %v2402_v33, %v880_v49 }
  0xb2   :  { %v515_v54 = vadd.f32 %v514_v12, %v2927_v60  ;;  %v891_v46 = vshll.u32 %v2402_v33, %v879_v44  ;;  %v892_v41 = vshrl.u32 %v2403_v35, %v880_v49  ;;  %v894_v40 = vshll.u32 %v2403_v35, %v879_v44 }
  0xb3   :  { %v621_v24 = vmul.f32 %v620_v9, %v618_v17  ;;  %v817_v42 = vshll.u32 %v2935_v6, 30  ;;  %v2165_v0 = vpop.eup %2164  ;;  %v895_v7 = vshrl.u32 %v2404_v43, %v880_v49  ;;  %vm2951_vm10 = vcmp.le.f32.partialorder %v538_v63, 0.7853982 }
  0xb4   :  { %v519_v28 = vsub.f32 %v515_v54, %v518_v53  ;;  %v625_v58 = vsel %vm540_vm8, %v624_v61, %v2845_v47  ;;  %v884_v50 = vor.u32 %v883_v10, %v882_v18  ;;  %v887_v23 = vor.u32 %v886_v20, %v885_v19 }
  0xb5   :  { %v622_v48 = vxor.u32 2147483648, %v621_v24  ;;  %v818_v2 = vsub.s32 %v814_v14, %v817_v42  ;;  %v2958_v62 = vshll.u32 %v873_v57, 8  ;;  %v890_v16 = vor.u32 %v889_v8, %v888_v11 }
  0xb6   :  { %v520_v25 = vsub.f32 %v519_v28, %v398_v59  ;;  %v893_v44 = vor.u32 %v892_v41, %v891_v46  ;;  %v896_v5 = vor.u32 %v895_v7, %v894_v40  ;;  %vm897_vm11 = vcmp.lt.s32.totalorder %v2932_v37, 1 }
  0xb7   :  { %v623_v39 = vsel %vm540_vm8, %v622_v48, %v621_v24  ;;  %v820_v30 = vsub.s32 0, %v818_v2  ;;  %vm900_vm12 = vcmp.lt.s32.totalorder %v2932_v37, 4  ;;  %v881_v59 = vshrl.u32 %v2399_v27, %v880_v49 }
  0xb8   :  { %v626_v63 = vsel %vm2951_vm10, %v2587_v36, %v623_v39  ;;  %v2966_v26 = vmul.f32 %v2165_v0, %v520_v25  ;;  %vm898_vm9 = vcmp.lt.s32.totalorder %v2932_v37, 2  ;;  %vm899_vm13 = vcmp.lt.s32.totalorder %v2932_v37, 3 }
  0xb9   :  { %2166 = vcosq.f32 %v626_v63  ;;  %v2041_v47 = vmin.u32 %v820_v30, %v818_v2  ;;  %v902_v9 = vsel %vm900_vm12, %v890_v16, 2102212464  ;;  %v905_v56 = vsel %vm897_vm11, %v884_v50, %v887_v23 }
  0xba   :  { %2168 = vsinq.f32 %v626_v63  ;;  %v526_v1 = vmul.f32 %v2966_v26, %v2830_v32  ;;  %v536_v14 = vmul.f32 0.1, %v2966_v26  ;;  %v906_v53 = vsel %vm900_vm12, %v893_v44, 920167782 }
  0xbb   :  { %v822_v13 = vclz %v2041_v47  ;;  %v909_v61 = vsel %vm897_vm11, %v887_v23, %v890_v16  ;;  %v910_v57 = vsel %vm900_vm12, %v896_v5, 1326507024  ;;  %v627_v12 = vsel %vm2951_vm10, 0, %v625_v58  ;;  %v3011_v58 = vld [vmem:[#allocation5] sm:$0xff] }
  0xbc   :  { %v2980_v49 = vadd.f32 %v536_v14, %v2562_v3  ;;  %v907_v32 = vsel %vm899_vm13, %v890_v16, %v906_v53  ;;  %v810_v18 = vadd.s32 %v2898_v38, %v2896_v4  ;;  %v901_v10 = vsel %vm897_vm11, %v881_v59, %v884_v50 }
  0xbd   :  { %v2042_v17 = vadd.s32 4294967294, %v822_v13  ;;  %v903_v19 = vsel %vm899_vm13, %v887_v23, %v902_v9  ;;  %v911_v3 = vsel %vm899_vm13, %v893_v44, %v910_v57  ;;  %v527_v20 = vadd.f32 %v526_v1, %v2922_v51 }
  0xbe   :  { %v908_v11 = vsel %vm898_vm9, %v905_v56, %v907_v32  ;;  %v912_v54 = vsel %vm898_vm9, %v909_v61, %v911_v3  ;;  %v991_v42 = vmul.f32 0.1, %v2980_v49  ;;  %v631_v41 = vand.u32 3, %v627_v12 }
  0xbf   :  { %vm2043_vm14 = vcmp.lt.s32.totalorder %v2042_v17, 0  ;;  %v3000_v4 = vmul.u32.u64.low %v2958_v62, %v912_v54  ;;  %v3001_v38 = vmul.u32.u64.high %v2958_v62, %v912_v54, %v3000_v4  ;;  %v904_v51 = vsel %vm898_vm9, %v901_v10, %v903_v19 }
  0xc0   :  { %v825_v24 = vsel %vm2043_vm14, 0, %v2042_v17  ;;  %v3007_v40 = vmul.u32.u64.low %v2958_v62, %v908_v11  ;;  %v3008_v7 = vmul.u32.u64.high %v2958_v62, %v908_v11, %v3007_v40  ;;  %v528_v48 = vsub.f32 0.0, %v527_v20 }
  0xc1   :  { %v826_v8 = vsub.s32 32, %v825_v24  ;;  %v827_v0 = vshll.u32 %v818_v2, %v825_v24  ;;  %v830_v46 = vsub.s32 4294967266, %v825_v24  ;;  %v3014_v50 = vadd.f32 %v3011_v58, %v991_v42 }
  0xc2   :  { %v920_v25 = vmul.u32 %v2958_v62, %v904_v51  ;;  %vm922_vm15 = vc.u32 %v3001_v38, %v3007_v40  ;;  %vm630_vm0 = vweird.f32 %v2587_v36  ;;  %vm632_vm1 = vcmp.lt.s32.totalorder %v631_v41, 2 }
  0xc3   :  { %v828_v28 = vshrl.u32 %v810_v18, %v826_v8  ;;  %v831_v52 = vadd.s32 127, %v830_v46  ;;  %vm636_vm2 = vcmp.eq.s32.totalorder %v631_v41, 2  ;;  %v923_v39 = vadd.s32 1, %v3008_v7 }
  0xc4   :  { %vm633_vm3 = vcmp.eq.s32.totalorder %v631_v41, 0  ;;  %v3027_v62 = vmul.f32 %v2860_v34, %v528_v48  ;;  %v1000_v59 = vand.u32 2139095040, %v3014_v50  ;;  %v734_v14 = vadd.s32 3, %v627_v12 }
  0xc5   :  { %v829_v23 = vor.u32 %v828_v28, %v827_v0  ;;  %v832_v2 = vshll.u32 %v831_v52, 23  ;;  %v924_v47 = vsel %vm922_vm15, %v923_v39, %v3008_v7  ;;  %v840_v53 = vsub.s32 4, %v2935_v6  ;;  %v3073_v39 = vld [vmem:[#allocation2] sm:$0xff] }
  0xc6   :  { %v3019_v37 = vpop.eup %2166  ;;  %v925_v9 = vadd.s32 %v924_v47, %v920_v25  ;;  %v534_v17 = vmul.f32 0.1, %v3027_v62  ;;  %vm756_vm4 = vcmp.lt.s32.totalorder %v2704_v15, 0  ;;  %v1001_v12 = vshrl.u32 %v1000_v59, 23 }
  0xc7   :  { %v3023_v30 = vpop.eup %2168  ;;  %v637_v16 = vxor.u32 2147483648, %v3019_v37  ;;  %v833_v63 = vor.u32 4788187, %v832_v2  ;;  %v836_v44 = vcvt.s32.f32 %v829_v23  ;;  %v3042_v18 = vand.u32 3, %v734_v14 }
  0xc8   :  { %v634_v5 = vxor.u32 2147483648, %v3023_v30  ;;  %v926_v57 = vadd.s32 536870912, %v925_v9  ;;  %v841_v3 = vsel %vm756_vm4, %v840_v53, %v2935_v6  ;;  %v997_v11 = vand.u32 2147483647, %v3014_v50 }
  0xc9   :  { %v638_v1 = vsel %vm636_vm2, %v637_v16, %v3023_v30  ;;  %v834_v13 = vand.u32 2147483647, %v833_v63  ;;  %v2049_v54 = vadd.s32 4294967169, %v1001_v12  ;;  %vm755_vm5 = vcmp.le.f32.partialorder %v754_v21, 0.7853982 }
  0xca   :  { %v635_v56 = vsel %vm633_vm3, %v3019_v37, %v634_v5  ;;  %v3045_v20 = vshrl.u32 %v926_v57, 30  ;;  %v3051_v4 = vadd.f32 %v534_v17, %v2619_v22  ;;  %vm740_vm6 = vcmp.eq.s32.totalorder %v3042_v18, 2 }
  0xcb   :  { %v639_v34 = vsel %vm632_vm1, %v635_v56, %v638_v1  ;;  %v837_v61 = vmul.f32 %v836_v44, %v834_v13  ;;  %v843_v0 = vsel %vm755_vm5, 0, %v841_v3  ;;  %v1007_v46 = vadd.s32 1, %v2049_v54 }
  0xcc   :  { %v640_v32 = vsel %vm630_vm0, nan, %v639_v34  ;;  %v928_v8 = vshll.u32 %v3045_v20, 30  ;;  %v989_v51 = vmul.f32 0.1, %v3051_v4  ;;  %v3061_v21 = vand.u32 8388607, %v997_v11 }
  0xcd   :  { %v745_v10 = vadd.f32 1.25, %v640_v32  ;;  %v838_v19 = vxor.u32 2147483648, %v837_v61  ;;  %vm1008_vm7 = vcmp.gt.s32.totalorder %v1007_v46, 0  ;;  %v3063_v7 = vand.u32 3, %v843_v0 }
  0xce   :  { %v3056_v41 = vsub.s32 %v925_v9, %v928_v8  ;;  %v1009_v52 = vsel %vm1008_vm7, %v1007_v46, 0  ;;  %v3067_v48 = vsel %vm740_vm6, %v637_v16, %v3023_v30  ;;  %v921_v23 = vadd.s32 %v3007_v40, %v3001_v38 }
  0xcf   :  { %v839_v24 = vsel %vm756_vm4, %v838_v19, %v837_v61  ;;  %v746_v42 = vadd.f32 0.25, %v745_v10  ;;  %v1011_v2 = vand.u32 31, %v1009_v52  ;;  %vm737_vm8 = vcmp.eq.s32.totalorder %v3042_v18, 0 }
  0xd0   :  { %v842_v6 = vsel %vm755_vm5, %v2704_v15, %v839_v24  ;;  %v931_v28 = vsub.s32 0, %v3056_v41  ;;  %v3076_v63 = vadd.f32 %v3073_v39, %v989_v51  ;;  %v1005_v44 = vor.u32 8388608, %v3061_v21 }
  0xd1   :  { %v747_v22 = vadd.f32 1.0, %v746_v42  ;;  %2170 = vcosq.f32 %v842_v6  ;;  %v3079_v47 = vshrl.u32 %v1009_v52, 5  ;;  %v1012_v16 = vsub.s32 32, %v1011_v2 }
  0xd2   :  { %2172 = vsinq.f32 %v842_v6  ;;  %v2046_v25 = vmin.u32 %v931_v28, %v3056_v41  ;;  %v1014_v59 = vshll.u32 %v2399_v27, %v1011_v2  ;;  %v1017_v38 = vshll.u32 %v2400_v29, %v1011_v2 }
  0xd3   :  { %v748_v40 = vadd.f32 1.0, %v747_v22  ;;  %v1020_v14 = vshll.u32 %v2401_v31, %v1011_v2  ;;  %v1023_v13 = vshll.u32 %v2402_v33, %v1011_v2  ;;  %v1015_v9 = vshrl.u32 %v2400_v29, %v1012_v16 }
  0xd4   :  { %v933_v1 = vclz %v2046_v25  ;;  %v1018_v56 = vshrl.u32 %v2401_v31, %v1012_v16  ;;  %v1021_v53 = vshrl.u32 %v2402_v33, %v1012_v16  ;;  %v1026_v34 = vshll.u32 %v2403_v35, %v1011_v2 }
  0xd5   :  { %vm736_vm10 = vcmp.lt.s32.totalorder %v3042_v18, 2  ;;  %v749_v61 = vmul.f32 0.5, %v640_v32  ;;  %v1024_v17 = vshrl.u32 %v2403_v35, %v1012_v16  ;;  %v1027_v12 = vshrl.u32 %v2404_v43, %v1012_v16 }
  0xd6   :  { %v2047_v57 = vadd.s32 4294967294, %v933_v1  ;;  %v1016_v10 = vor.u32 %v1015_v9, %v1014_v59  ;;  %v1019_v19 = vor.u32 %v1018_v56, %v1017_v38  ;;  %vm1029_vm11 = vcmp.lt.s32.totalorder %v3079_v47, 1 }
  0xd7   :  { %v1211_v3 = vadd.f32 %v3014_v50, %v3076_v63  ;;  %vm867_vm12 = vcmp.lt.s32.totalorder %v2810_v45, 0  ;;  %v1022_v54 = vor.u32 %v1021_v53, %v1020_v14  ;;  %v1025_v24 = vor.u32 %v1024_v17, %v1023_v13 }
  0xd8   :  { %vm2048_vm9 = vcmp.lt.s32.totalorder %v2047_v57, 0  ;;  %vm1032_vm13 = vcmp.lt.s32.totalorder %v3079_v47, 4  ;;  %2174 = vrcp.f32 %v748_v40  ;;  %v1028_v42 = vor.u32 %v1027_v12, %v1026_v34 }
  0xd9   :  { %v936_v32 = vsel %vm2048_vm9, 0, %v2047_v57  ;;  %vm1031_vm14 = vcmp.lt.s32.totalorder %v3079_v47, 3  ;;  %v1013_v6 = vshrl.u32 %v2399_v27, %v1012_v16  ;;  %vm1030_vm15 = vcmp.lt.s32.totalorder %v3079_v47, 2 }
  0xda   :  { %v937_v8 = vsub.s32 32, %v936_v32  ;;  %v938_v0 = vshll.u32 %v3056_v41, %v936_v32  ;;  %v941_v46 = vsub.s32 4294967266, %v936_v32  ;;  %v1034_v51 = vsel %vm1032_vm13, %v1022_v54, 2102212464 }
  0xdb   :  { %v1037_v21 = vsel %vm1029_vm11, %v1016_v10, %v1019_v19  ;;  %v1038_v22 = vsel %vm1032_vm13, %v1025_v24, 920167782  ;;  %vm849_vm1 = vcmp.eq.s32.totalorder %v3063_v7, 0  ;;  %vm852_vm2 = vcmp.eq.s32.totalorder %v3063_v7, 2 }
  0xdc   :  { %v939_v28 = vshrl.u32 %v921_v23, %v937_v8  ;;  %v942_v41 = vadd.s32 127, %v941_v46  ;;  %v1039_v52 = vsel %vm1031_vm14, %v1022_v54, %v1038_v22  ;;  %v1041_v2 = vsel %vm1029_vm11, %v1019_v19, %v1022_v54 }
  0xdd   :  { %v739_v25 = vsel %vm737_vm8, %v3019_v37, %v634_v5  ;;  %vm3120_vm3 = vcmp.le.f32.partialorder %v865_v55, 0.7853982  ;;  %v951_v23 = vsub.s32 4, %v3045_v20  ;;  %v1042_v59 = vsel %vm1032_vm13, %v1028_v42, 1326507024 }
  0xde   :  { %v1045_v38 = vshll.u32 %v1005_v44, 8  ;;  %v2171_v40 = vpop.eup %2170  ;;  %v940_v1 = vor.u32 %v939_v28, %v938_v0  ;;  %v943_v14 = vshll.u32 %v942_v41, 23  ;;  %v1043_v30 = vsel %vm1031_vm14, %v1025_v24, %v1042_v59 }
  0xdf   :  { %v3129_v13 = vadd.f32 -1.5707964, %v1211_v3  ;;  %v2173_v37 = vpop.eup %2172  ;;  %vm848_vm4 = vcmp.lt.s32.totalorder %v3063_v7, 2  ;;  %v1033_v55 = vsel %vm1029_vm11, %v1013_v6, %v1016_v10  ;;  %v1035_v5 = vsel %vm1031_vm14, %v1019_v19, %v1034_v51 }
  0xe0   :  { %v1040_v44 = vsel %vm1030_vm15, %v1037_v21, %v1039_v52  ;;  %v1044_v9 = vsel %vm1030_vm15, %v1041_v2, %v1043_v30  ;;  %v750_v56 = vadd.f32 0.25, %v749_v61  ;;  %v858_v53 = vmul.f32 -0.5, %v2980_v49 }
  0xe1   :  { %v944_v34 = vor.u32 4788187, %v943_v14  ;;  %v947_v57 = vcvt.s32.f32 %v940_v1  ;;  %v743_v17 = vsel %vm736_vm10, %v739_v25, %v3067_v48  ;;  %v952_v12 = vsel %vm867_vm12, %v951_v23, %v3045_v20 }
  0xe2   :  { %v3147_v10 = vmul.u32.u64.low %v1045_v38, %v1044_v9  ;;  %v3148_v19 = vmul.u32.u64.high %v1045_v38, %v1044_v9, %v3147_v10  ;;  %vm846_vm5 = vweird.f32 %v2704_v15  ;;  %v1036_v61 = vsel %vm1030_vm15, %v1033_v55, %v1035_v5 }
  0xe3   :  { %v945_v3 = vand.u32 2147483647, %v944_v34  ;;  %v3153_v54 = vmul.u32.u64.low %v1045_v38, %v1040_v44  ;;  %v3154_v24 = vmul.u32.u64.high %v1045_v38, %v1040_v44, %v3153_v54  ;;  %v850_v32 = vxor.u32 2147483648, %v2173_v37 }
  0xe4   :  { %v853_v18 = vxor.u32 2147483648, %v2171_v40  ;;  %v1216_v48 = vand.u32 2139095040, %v3129_v13  ;;  %v3159_v42 = vadd.f32 -1.5707964, %v3076_v63  ;;  %v3161_v20 = vadd.f32 1.0, %v750_v56 }
  0xe5   :  { %v859_v8 = vmul.f32 %v858_v53, %v2980_v49  ;;  %v861_v0 = vmul.f32 %v2980_v49, %v3051_v4  ;;  %v948_v47 = vmul.f32 %v947_v57, %v945_v3  ;;  %v975_v46 = vmul.f32 0.5, %v3051_v4  ;;  %v3169_v21 = vpop.eup %2174 }
  0xe6   :  { %v1052_v6 = vmul.u32 %v1045_v38, %v1036_v61  ;;  %vm1054_vm6 = vc.u32 %v3148_v19, %v3153_v54  ;;  %v1217_v51 = vshrl.u32 %v1216_v48, 23  ;;  %v3173_v63 = vsel %vm630_vm0, nan, %v743_v17 }
  0xe7   :  { %v949_v22 = vxor.u32 2147483648, %v948_v47  ;;  %v954_v28 = vsel %vm3120_vm3, 0, %v952_v12  ;;  %v1055_v41 = vadd.s32 1, %v3154_v24  ;;  %v851_v52 = vsel %vm849_vm1, %v2171_v40, %v850_v32 }
  0xe8   :  { %v854_v2 = vsel %vm852_vm2, %v853_v18, %v2173_v37  ;;  %v2058_v25 = vadd.s32 4294967169, %v1217_v51  ;;  %v1327_v23 = vand.u32 2139095040, %v3159_v42  ;;  %v980_v59 = vmul.f32 %v3161_v20, %v3161_v20 }
  0xe9   :  { %v950_v36 = vsel %vm867_vm12, %v949_v22, %v948_v47  ;;  %v1056_v38 = vsel %vm1054_vm6, %v1055_v41, %v3154_v24  ;;  %v1213_v1 = vand.u32 2147483647, %v3129_v13  ;;  %v3190_v14 = vmul.f32 %v859_v8, %v3173_v63 }
  0xea   :  { %v953_v40 = vsel %vm3120_vm3, %v2810_v45, %v950_v36  ;;  %v1057_v30 = vadd.s32 %v1056_v38, %v1052_v6  ;;  %v1223_v37 = vadd.s32 1, %v2058_v25  ;;  %v855_v55 = vsel %vm848_vm4, %v851_v52, %v854_v2 }
  0xeb   :  { %v3198_v5 = vmul.f32 %v861_v0, %v3173_v63  ;;  %2176 = vcosq.f32 %v953_v40  ;;  %v3200_v44 = vand.u32 3, %v954_v28  ;;  %v1328_v56 = vshrl.u32 %v1327_v23, 23 }
  0xec   :  { %2178 = vsinq.f32 %v953_v40  ;;  %v1058_v9 = vadd.s32 536870912, %v1057_v30  ;;  %vm1224_vm0 = vcmp.gt.s32.totalorder %v1223_v37, 0  ;;  %v981_v53 = vmul.f32 %v3169_v21, %v980_v59 }
  0xed   :  { %v1220_v16 = vand.u32 8388607, %v1213_v1  ;;  %v1225_v34 = vsel %vm1224_vm0, %v1223_v37, 0  ;;  %v856_v7 = vsel %vm846_vm5, nan, %v855_v55  ;;  %v863_v12 = vsub.f32 %v3190_v14, %v3198_v5 }
  0xee   :  { %v3207_v57 = vshrl.u32 %v1058_v9, 30  ;;  %v1227_v17 = vand.u32 31, %v1225_v34  ;;  %v3212_v10 = vmul.f32 %v975_v46, %v3051_v4  ;;  %vm963_vm7 = vcmp.eq.s32.totalorder %v3200_v44, 2 }
  0xef   :  { %v2063_v24 = vadd.s32 4294967169, %v1328_v56  ;;  %v3216_v32 = vmul.f32 4.9, %v856_v7  ;;  %vm960_vm8 = vcmp.eq.s32.totalorder %v3200_v44, 0  ;;  %v3221_v15 = vmul.f32 %v3169_v21, %v3161_v20 }
  0xf0   :  { %v1060_v3 = vshll.u32 %v3207_v57, 30  ;;  %v1228_v61 = vsub.s32 32, %v1227_v17  ;;  %v982_v18 = vsub.f32 1.25, %v981_v53  ;;  %v1221_v48 = vor.u32 8388608, %v1220_v16 }
  0xf1   :  { %vm959_vm10 = vcmp.lt.s32.totalorder %v3200_v44, 2  ;;  %v1230_v0 = vshll.u32 %v2399_v27, %v1227_v17  ;;  %v1233_v46 = vshll.u32 %v2400_v29, %v1227_v17  ;;  %vm957_vm11 = vweird.f32 %v2810_v45 }
  0xf2   :  { %v3224_v8 = vsub.s32 %v1057_v30, %v1060_v3  ;;  %v1231_v47 = vshrl.u32 %v2400_v29, %v1228_v61  ;;  %v1226_v6 = vshrl.u32 %v1225_v34, 5  ;;  %v1234_v51 = vshrl.u32 %v2401_v31, %v1228_v61 }
  0xf3   :  { %v1239_v22 = vshll.u32 %v2402_v33, %v1227_v17  ;;  %v1240_v28 = vshrl.u32 %v2403_v35, %v1228_v61  ;;  %v1236_v52 = vshll.u32 %v2401_v31, %v1227_v17  ;;  %v1237_v2 = vshrl.u32 %v2402_v33, %v1228_v61 }
  0xf4   :  { %v1063_v41 = vsub.s32 0, %v3224_v8  ;;  %v1334_v25 = vadd.s32 1, %v2063_v24  ;;  %2180 = vrcp.f32 %v982_v18  ;;  %v1242_v23 = vshll.u32 %v2403_v35, %v1227_v17 }
  0xf5   :  { %v1243_v36 = vshrl.u32 %v2404_v43, %v1228_v61  ;;  %v1324_v59 = vand.u32 2147483647, %v3159_v42  ;;  %v1053_v38 = vadd.s32 %v3153_v54, %v3148_v19  ;;  %v1232_v30 = vor.u32 %v1231_v47, %v1230_v0 }
  0xf6   :  { %v2050_v40 = vmin.u32 %v1063_v41, %v3224_v8  ;;  %v1235_v37 = vor.u32 %v1234_v51, %v1233_v46  ;;  %v1229_v55 = vshrl.u32 %v2399_v27, %v1228_v61  ;;  %v1241_v9 = vor.u32 %v1240_v28, %v1239_v22 }
  0xf7   :  { %vm1245_vm12 = vcmp.lt.s32.totalorder %v1226_v6, 1  ;;  %v3243_v56 = vshll.u32 %v1221_v48, 8  ;;  %v1238_v34 = vor.u32 %v1237_v2, %v1236_v52  ;;  %vm1248_vm9 = vcmp.lt.s32.totalorder %v1226_v6, 4 }
  0xf8   :  { %v2177_v53 = vpop.eup %2176  ;;  %v1065_v16 = vclz %v2050_v40  ;;  %vm1335_vm13 = vcmp.gt.s32.totalorder %v1334_v25, 0  ;;  %v1244_v3 = vor.u32 %v1243_v36, %v1242_v23  ;;  %vm1246_vm14 = vcmp.lt.s32.totalorder %v1226_v6, 2 }
  0xf9   :  { %v2179_v7 = vpop.eup %2178  ;;  %v964_v17 = vxor.u32 2147483648, %v2177_v53  ;;  %vm1247_vm15 = vcmp.lt.s32.totalorder %v1226_v6, 3  ;;  %v1250_v24 = vsel %vm1248_vm9, %v1238_v34, 2102212464  ;;  %v1253_v61 = vsel %vm1245_vm12, %v1232_v30, %v1235_v37 }
  0xfa   :  { %v961_v19 = vxor.u32 2147483648, %v2179_v7  ;;  %v2051_v54 = vadd.s32 4294967294, %v1065_v16  ;;  %v1249_v48 = vsel %vm1245_vm12, %v1229_v55, %v1232_v30  ;;  %v1251_v0 = vsel %vm1247_vm15, %v1235_v37, %v1250_v24 }
  0xfb   :  { %v965_v18 = vsel %vm963_vm7, %v964_v17, %v2179_v7  ;;  %v1254_v47 = vsel %vm1248_vm9, %v1241_v9, 920167782  ;;  %v1257_v22 = vsel %vm1245_vm12, %v1235_v37, %v1238_v34  ;;  %v1258_v2 = vsel %vm1248_vm9, %v1244_v3, 1326507024 }
  0xfc   :  { %v962_v46 = vsel %vm960_vm8, %v2177_v53, %v961_v19  ;;  %vm2052_vm1 = vcmp.lt.s32.totalorder %v2051_v54, 0  ;;  %v1255_v51 = vsel %vm1247_vm15, %v1238_v34, %v1254_v47  ;;  %v1259_v53 = vsel %vm1247_vm15, %v1241_v9, %v1258_v2 }
  0xfd   :  { %v966_v28 = vsel %vm959_vm10, %v962_v46, %v965_v18  ;;  %v1068_v41 = vsel %vm2052_vm1, 0, %v2051_v54  ;;  %v1256_v52 = vsel %vm1246_vm14, %v1253_v61, %v1255_v51  ;;  %v1252_v7 = vsel %vm1246_vm14, %v1249_v48, %v1251_v0 }
  0xfe   :  { %v967_v23 = vsel %vm957_vm11, nan, %v966_v28  ;;  %v1069_v36 = vsub.s32 32, %v1068_v41  ;;  %v1070_v40 = vshll.u32 %v3224_v8, %v1068_v41  ;;  %v1073_v30 = vsub.s32 4294967266, %v1068_v41 }
  0xff   :  { %v968_v55 = vmul.f32 14.7, %v967_v23  ;;  %v3265_v37 = vmul.u32.u64.low %v3243_v56, %v1256_v52  ;;  %v3266_v16 = vmul.u32.u64.high %v3243_v56, %v1256_v52, %v3265_v37  ;;  %v1260_v17 = vsel %vm1246_vm14, %v1257_v22, %v1259_v53 }
 0x100   :  { %v1071_v44 = vshrl.u32 %v1053_v38, %v1069_v36  ;;  %v1074_v34 = vadd.s32 127, %v1073_v30  ;;  %v3275_v8 = vmul.u32.u64.low %v3243_v56, %v1260_v17  ;;  %v3276_v3 = vmul.u32.u64.high %v3243_v56, %v1260_v17, %v3275_v8 }
 0x101   :  { %v969_v45 = vadd.f32 %v968_v55, %v863_v12  ;;  %v1336_v9 = vsel %vm1335_vm13, %v1334_v25, 0  ;;  %v2181_v19 = vpop.eup %2180  ;;  %v1268_v6 = vmul.u32 %v3243_v56, %v1252_v7  ;;  %v1271_v18 = vadd.s32 1, %v3266_v16 }
 0x102   :  { %v1072_v54 = vor.u32 %v1071_v44, %v1070_v40  ;;  %v1075_v24 = vshll.u32 %v1074_v34, 23  ;;  %v1338_v61 = vand.u32 31, %v1336_v9  ;;  %vm999_vm2 = vcmp.lt.s32.totalorder %v3014_v50, 0 }
 0x103   :  { %v3280_v38 = vadd.f32 %v969_v45, %v3216_v32  ;;  %v977_v25 = vmul.f32 %v3212_v10, %v3173_v63  ;;  %vm1270_vm3 = vc.u32 %v3276_v3, %v3265_v37  ;;  %v1331_v0 = vand.u32 8388607, %v1324_v59 }
 0x104   :  { %v1076_v14 = vor.u32 4788187, %v1075_v24  ;;  %v1079_v5 = vcvt.s32.f32 %v1072_v54  ;;  %v1339_v12 = vsub.s32 32, %v1338_v61  ;;  %v1272_v47 = vsel %vm1270_vm3, %v1271_v18, %v3266_v16 }
 0x105   :  { %v973_v48 = vmul.f32 %v3221_v15, %v3280_v38  ;;  %v3294_v46 = vshrl.u32 %v1336_v9, 5  ;;  %v1341_v51 = vshll.u32 %v2399_v27, %v1338_v61  ;;  %v1273_v28 = vadd.s32 %v1272_v47, %v1268_v6 }
 0x106   :  { %v1077_v56 = vand.u32 2147483647, %v1076_v14  ;;  %v1342_v15 = vshrl.u32 %v2400_v29, %v1339_v12  ;;  %v1344_v63 = vshll.u32 %v2400_v29, %v1338_v61  ;;  %v1345_v41 = vshrl.u32 %v2401_v31, %v1339_v12 }
 0x107   :  { %v974_v22 = vadd.f32 %v973_v48, %v2927_v60  ;;  %v1347_v52 = vshll.u32 %v2401_v31, %v1338_v61  ;;  %v1350_v2 = vshll.u32 %v2402_v33, %v1338_v61  ;;  %v1274_v36 = vadd.s32 536870912, %v1273_v28 }
 0x108   :  { %v1080_v10 = vmul.f32 %v1079_v5, %v1077_v56  ;;  %v1348_v40 = vshrl.u32 %v2402_v33, %v1339_v12  ;;  %v1351_v30 = vshrl.u32 %v2403_v35, %v1339_v12  ;;  %vm3307_vm4 = vcmp.le.f32.partialorder %v997_v11, 0.7853982 }
 0x109   :  { %v978_v23 = vsub.f32 %v974_v22, %v977_v25  ;;  %v1353_v53 = vshll.u32 %v2403_v35, %v1338_v61  ;;  %v1354_v16 = vshrl.u32 %v2404_v43, %v1339_v12  ;;  %v1083_v34 = vsub.s32 4, %v3207_v57 }
 0x10a   :  { %v1081_v55 = vxor.u32 2147483648, %v1080_v10  ;;  %v3315_v7 = vshrl.u32 %v1274_v36, 30  ;;  %v1332_v17 = vor.u32 8388608, %v1331_v0  ;;  %v1343_v8 = vor.u32 %v1342_v15, %v1341_v51 }
 0x10b   :  { %v979_v44 = vsub.f32 %v978_v23, %v3216_v32  ;;  %v1346_v11 = vor.u32 %v1345_v41, %v1344_v63  ;;  %v1352_v9 = vor.u32 %v1351_v30, %v1350_v2  ;;  %v1349_v61 = vor.u32 %v1348_v40, %v1347_v52 }
 0x10c   :  { %v1082_v45 = vsel %vm999_vm2, %v1081_v55, %v1080_v10  ;;  %v1276_v24 = vshll.u32 %v3315_v7, 30  ;;  %vm1356_vm5 = vcmp.lt.s32.totalorder %v3294_v46, 1  ;;  %v1355_v6 = vor.u32 %v1354_v16, %v1353_v53 }
 0x10d   :  { %v1085_v54 = vsel %vm3307_vm4, %v3014_v50, %v1082_v45  ;;  %v3324_v32 = vmul.f32 %v2181_v19, %v979_v44  ;;  %vm1359_vm6 = vcmp.lt.s32.totalorder %v3294_v46, 4  ;;  %v1084_v18 = vsel %vm999_vm2, %v1083_v34, %v3207_v57 }
 0x10e   :  { %2182 = vcosq.f32 %v1085_v54  ;;  %v1277_v14 = vsub.s32 %v1273_v28, %v1276_v24  ;;  %vm1358_vm0 = vcmp.lt.s32.totalorder %v3294_v46, 3  ;;  %v1340_v48 = vshrl.u32 %v2399_v27, %v1339_v12 }
 0x10f   :  { %2184 = vsinq.f32 %v1085_v54  ;;  %v985_v5 = vmul.f32 %v3324_v32, %v3161_v20  ;;  %v1365_v25 = vsel %vm1359_vm6, %v1352_v9, 920167782  ;;  %vm1357_vm7 = vcmp.lt.s32.totalorder %v3294_v46, 2 }
 0x110   :  { %v1279_v19 = vsub.s32 0, %v1277_v14  ;;  %v1361_v0 = vsel %vm1359_vm6, %v1349_v61, 2102212464  ;;  %v1364_v56 = vsel %vm1356_vm5, %v1343_v8, %v1346_v11  ;;  %v1086_v57 = vsel %vm3307_vm4, 0, %v1084_v18 }
 0x111   :  { %v1366_v47 = vsel %vm1358_vm0, %v1349_v61, %v1365_v25  ;;  %v1369_v51 = vsel %vm1359_vm6, %v1355_v6, 1326507024  ;;  %v1372_v22 = vshll.u32 %v1332_v17, 8  ;;  %v1368_v20 = vsel %vm1356_vm5, %v1346_v11, %v1349_v61  ;;  %v3366_v17 = vld [vmem:[#allocation8] sm:$0xff] }
 0x112   :  { %v2059_v28 = vmin.u32 %v1279_v19, %v1277_v14  ;;  %v986_v12 = vadd.f32 %v985_v5, %v3280_v38  ;;  %v1360_v15 = vsel %vm1356_vm5, %v1340_v48, %v1343_v8  ;;  %v1362_v63 = vsel %vm1358_vm0, %v1346_v11, %v1361_v0 }
 0x113   :  { %v1367_v10 = vsel %vm1357_vm7, %v1364_v56, %v1366_v47  ;;  %v1090_v41 = vand.u32 3, %v1086_v57  ;;  %v1370_v2 = vsel %vm1358_vm0, %v1352_v9, %v1369_v51  ;;  %v995_v23 = vmul.f32 0.1, %v3324_v32 }
 0x114   :  { %v1281_v52 = vclz %v2059_v28  ;;  %v1371_v36 = vsel %vm1357_vm7, %v1368_v20, %v1370_v2  ;;  %v3355_v38 = vmul.u32.u64.low %v1372_v22, %v1367_v10  ;;  %v3356_v40 = vmul.u32.u64.high %v1372_v22, %v1367_v10, %v3355_v38 }
 0x115   :  { %v1363_v60 = vsel %vm1357_vm7, %v1360_v15, %v1362_v63  ;;  %v3361_v55 = vmul.u32.u64.low %v1372_v22, %v1371_v36  ;;  %v3362_v53 = vmul.u32.u64.high %v1372_v22, %v1371_v36, %v3361_v55  ;;  %v987_v16 = vsub.f32 0.0, %v986_v12 }
 0x116   :  { %v2060_v30 = vadd.s32 4294967294, %v1281_v52  ;;  %v1193_v44 = vadd.s32 3, %v1086_v57  ;;  %vm1091_vm8 = vcmp.lt.s32.totalorder %v1090_v41, 2  ;;  %vm1092_vm10 = vcmp.eq.s32.totalorder %v1090_v41, 0 }
 0x117   :  { %v1269_v34 = vadd.s32 %v3265_v37, %v3276_v3  ;;  %v3369_v45 = vadd.f32 %v3366_v17, %v995_v23  ;;  %v1379_v11 = vmul.u32 %v1372_v22, %v1363_v60  ;;  %v1382_v46 = vadd.s32 1, %v3356_v40 }
 0x118   :  { %vm2061_vm11 = vcmp.lt.s32.totalorder %v2060_v30, 0  ;;  %vm1095_vm12 = vcmp.eq.s32.totalorder %v1090_v41, 2  ;;  %v3373_v18 = vmul.f32 %v3169_v21, %v987_v16  ;;  %v1194_v3 = vand.u32 3, %v1193_v44  ;;  %v3392_v41 = vld [vmem:[#allocation7] sm:$0xff] }
 0x119   :  { %v1284_v8 = vsel %vm2061_vm11, 0, %v2060_v30  ;;  %vm1381_vm9 = vc.u32 %v3362_v53, %v3355_v38  ;;  %vm1089_vm13 = vweird.f32 %v3014_v50  ;;  %v1299_v28 = vsub.s32 4, %v3315_v7 }
 0x11a   :  { %v1285_v54 = vsub.s32 32, %v1284_v8  ;;  %v1286_v24 = vshll.u32 %v1277_v14, %v1284_v8  ;;  %v1289_v61 = vsub.s32 4294967266, %v1284_v8  ;;  %v1383_v19 = vsel %vm1381_vm9, %v1382_v46, %v3356_v40 }
 0x11b   :  { %v2183_v9 = vpop.eup %2182  ;;  %v1384_v56 = vadd.s32 %v1383_v19, %v1379_v11  ;;  %v1450_v14 = vmul.f32 0.2, %v3369_v45  ;;  %v993_v51 = vmul.f32 0.1, %v3373_v18  ;;  %vm1199_vm14 = vcmp.eq.s32.totalorder %v1194_v3, 2 }
 0x11c   :  { %v2185_v6 = vpop.eup %2184  ;;  %v1096_v37 = vxor.u32 2147483648, %v2183_v9  ;;  %v1287_v48 = vshrl.u32 %v1269_v34, %v1285_v54  ;;  %v1290_v25 = vadd.s32 127, %v1289_v61  ;;  %vm1196_vm15 = vcmp.eq.s32.totalorder %v1194_v3, 0 }
 0x11d   :  { %v1093_v5 = vxor.u32 2147483648, %v2185_v6  ;;  %v1385_v20 = vadd.s32 536870912, %v1384_v56  ;;  %v3387_v52 = vadd.f32 %v3011_v58, %v1450_v14  ;;  %vm1215_vm1 = vcmp.lt.s32.totalorder %v3129_v13, 0 }
 0x11e   :  { %v1097_v0 = vsel %vm1095_vm12, %v1096_v37, %v2185_v6  ;;  %v1288_v21 = vor.u32 %v1287_v48, %v1286_v24  ;;  %v1291_v47 = vshll.u32 %v1290_v25, 23  ;;  %v3395_v36 = vadd.f32 %v3392_v41, %v993_v51 }
 0x11f   :  { %v1094_v57 = vsel %vm1092_vm10, %v2183_v9, %v1093_v5  ;;  %v3390_v23 = vshrl.u32 %v1385_v20, 30  ;;  %vm1195_vm2 = vcmp.lt.s32.totalorder %v1194_v3, 2  ;;  %v1201_v40 = vsel %vm1199_vm14, %v1096_v37, %v2185_v6 }
 0x120   :  { %v1098_v22 = vsel %vm1091_vm8, %v1094_v57, %v1097_v0  ;;  %v1292_v15 = vor.u32 4788187, %v1291_v47  ;;  %v1295_v63 = vcvt.s32.f32 %v1288_v21  ;;  %v1300_v30 = vsel %vm1215_vm1, %v1299_v28, %v3315_v7 }
 0x121   :  { %v1099_v12 = vsel %vm1089_vm13, nan, %v1098_v22  ;;  %v1198_v60 = vsel %vm1196_vm15, %v2183_v9, %v1093_v5  ;;  %v1387_v16 = vshll.u32 %v3390_v23, 30  ;;  %vm1214_vm3 = vcmp.le.f32.partialorder %v1213_v1, 0.7853982 }
 0x122   :  { %v1204_v10 = vadd.f32 1.25, %v1099_v12  ;;  %v1293_v2 = vand.u32 2147483647, %v1292_v15  ;;  %v1914_v44 = vmul.f32 2.0, %v2980_v49  ;;  %v1459_v34 = vand.u32 2139095040, %v3387_v52 }
 0x123   :  { %v1302_v11 = vsel %vm1214_vm3, 0, %v1300_v30  ;;  %v1317_v46 = vmul.f32 -0.5, %v3369_v45  ;;  %v3406_v54 = vsub.s32 %v1384_v56, %v1387_v16  ;;  %v1202_v24 = vsel %vm1195_vm2, %v1198_v60, %v1201_v40 }
 0x124   :  { %v1205_v55 = vadd.f32 0.25, %v1204_v10  ;;  %v1296_v58 = vmul.f32 %v1295_v63, %v1293_v2  ;;  %v1208_v7 = vmul.f32 0.5, %v1099_v12  ;;  %v1460_v9 = vshrl.u32 %v1459_v34, 23 }
 0x125   :  { %v1390_v37 = vsub.s32 0, %v3406_v54  ;;  %v1448_v1 = vmul.f32 0.2, %v3395_v36  ;;  %v3413_v3 = vand.u32 3, %v1302_v11  ;;  %v3416_v5 = vadd.f32 %v3366_v17, %v1914_v44 }
 0x126   :  { %v1297_v8 = vxor.u32 2147483648, %v1296_v58  ;;  %v1206_v61 = vadd.f32 1.0, %v1205_v55  ;;  %v2067_v48 = vadd.s32 4294967169, %v1460_v9  ;;  %v1318_v25 = vmul.f32 %v1317_v46, %v3369_v45 }
 0x127   :  { %v1320_v19 = vmul.f32 %v3369_v45, %v3395_v36  ;;  %v2064_v0 = vmin.u32 %v1390_v37, %v3406_v54  ;;  %v1434_v56 = vmul.f32 0.5, %v3395_v36  ;;  %v3425_v14 = vsel %vm1089_vm13, nan, %v1202_v24 }
 0x128   :  { %v1298_v6 = vsel %vm1215_vm1, %v1297_v8, %v1296_v58  ;;  %v1209_v57 = vadd.f32 0.25, %v1208_v7  ;;  %v1466_v21 = vadd.s32 1, %v2067_v48  ;;  %v1207_v47 = vadd.f32 1.0, %v1206_v61 }
 0x129   :  { %v1301_v49 = vsel %vm1214_vm3, %v3129_v13, %v1298_v6  ;;  %vm1326_vm4 = vcmp.lt.s32.totalorder %v3159_v42, 0  ;;  %v1392_v51 = vclz %v2064_v0  ;;  %v1449_v22 = vadd.f32 %v3073_v39, %v1448_v1 }
 0x12a   :  { %2186 = vcosq.f32 %v1301_v49  ;;  %v1456_v28 = vand.u32 2147483647, %v3387_v52  ;;  %v1380_v20 = vadd.s32 %v3355_v38, %v3362_v53  ;;  %v3433_v12 = vmul.f32 2.0, %v3369_v45 }
 0x12b   :  { %2188 = vsinq.f32 %v1301_v49  ;;  %vm1467_vm5 = vcmp.gt.s32.totalorder %v1466_v21, 0  ;;  %v3436_v50 = vmul.f32 %v1318_v25, %v3425_v14  ;;  %v2065_v15 = vadd.s32 4294967294, %v1392_v51 }
 0x12c   :  { %v3439_v63 = vmul.f32 %v1434_v56, %v3395_v36  ;;  %v1468_v10 = vsel %vm1467_vm5, %v1466_v21, 0  ;;  %v3441_v2 = vadd.f32 1.0, %v1209_v57  ;;  %v3444_v39 = vmul.f32 %v1320_v19, %v3425_v14 }
 0x12d   :  { %v1410_v40 = vsub.s32 4, %v3390_v23  ;;  %v1470_v38 = vand.u32 31, %v1468_v10  ;;  %vm2066_vm6 = vcmp.lt.s32.totalorder %v2065_v15, 0  ;;  %2190 = vrcp.f32 %v1207_v47 }
 0x12e   :  { %v1463_v53 = vand.u32 8388607, %v1456_v28  ;;  %v1670_v45 = vadd.f32 %v3387_v52, %v1449_v22  ;;  %v1395_v30 = vsel %vm2066_vm6, 0, %v2065_v15  ;;  %v3450_v60 = vshrl.u32 %v1468_v10, 5 }
 0x12f   :  { %v1471_v55 = vsub.s32 32, %v1470_v38  ;;  %v1473_v58 = vshll.u32 %v2399_v27, %v1470_v38  ;;  %v1396_v16 = vsub.s32 32, %v1395_v30  ;;  %v1397_v44 = vshll.u32 %v3406_v54, %v1395_v30 }
 0x130   :  { %v1400_v34 = vsub.s32 4294967266, %v1395_v30  ;;  %v1476_v8 = vshll.u32 %v2400_v29, %v1470_v38  ;;  %v1479_v24 = vshll.u32 %v2401_v31, %v1470_v38  ;;  %v1482_v6 = vshll.u32 %v2402_v33, %v1470_v38 }
 0x131   :  { %v1474_v11 = vshrl.u32 %v2400_v29, %v1471_v55  ;;  %v1477_v46 = vshrl.u32 %v2401_v31, %v1471_v55  ;;  %v1480_v7 = vshrl.u32 %v2402_v33, %v1471_v55  ;;  %v1398_v9 = vshrl.u32 %v1380_v20, %v1396_v16 }
 0x132   :  { %v1401_v61 = vadd.s32 127, %v1400_v34  ;;  %v1483_v37 = vshrl.u32 %v2403_v35, %v1471_v55  ;;  %v3464_v54 = vsel %vm1326_vm4, %v1410_v40, %v3390_v23  ;;  %v1464_v1 = vor.u32 8388608, %v1463_v53 }
 0x133   :  { %v1485_v49 = vshll.u32 %v2403_v35, %v1470_v38  ;;  %v3467_v48 = vadd.f32 -1.5707964, %v1449_v22  ;;  %vm1308_vm0 = vcmp.eq.s32.totalorder %v3413_v3, 0  ;;  %vm1311_vm7 = vcmp.eq.s32.totalorder %v3413_v3, 2 }
 0x134   :  { %vm3473_vm8 = vcmp.le.f32.partialorder %v1324_v59, 0.7853982  ;;  %v1399_v19 = vor.u32 %v1398_v9, %v1397_v44  ;;  %v1402_v0 = vshll.u32 %v1401_v61, 23  ;;  %v1486_v23 = vshrl.u32 %v2404_v43, %v1471_v55 }
 0x135   :  { %v3478_v56 = vadd.f32 -1.5707964, %v1670_v45  ;;  %v1472_v57 = vshrl.u32 %v2399_v27, %v1471_v55  ;;  %v1475_v21 = vor.u32 %v1474_v11, %v1473_v58  ;;  %v1478_v47 = vor.u32 %v1477_v46, %v1476_v8 }
 0x136   :  { %v1481_v51 = vor.u32 %v1480_v7, %v1479_v24  ;;  %v1403_v20 = vor.u32 4788187, %v1402_v0  ;;  %v1406_v15 = vcvt.s32.f32 %v1399_v19  ;;  %v1484_v10 = vor.u32 %v1483_v37, %v1482_v6 }
 0x137   :  { %v2187_v22 = vpop.eup %2186  ;;  %vm1488_vm10 = vcmp.lt.s32.totalorder %v3450_v60, 1  ;;  %vm1307_vm11 = vcmp.lt.s32.totalorder %v3413_v3, 2  ;;  %v1439_v59 = vmul.f32 %v3441_v2, %v3441_v2  ;;  %v1487_v40 = vor.u32 %v1486_v23, %v1485_v49 }
 0x138   :  { %vm1491_vm12 = vcmp.lt.s32.totalorder %v3450_v60, 4  ;;  %v1783_v38 = vand.u32 2147483647, %v3467_v48  ;;  %v2189_v53 = vpop.eup %2188  ;;  %v1404_v45 = vand.u32 2147483647, %v1403_v20  ;;  %vm1490_vm9 = vcmp.lt.s32.totalorder %v3450_v60, 3 }
 0x139   :  { %v1493_v30 = vsel %vm1491_vm12, %v1481_v51, 2102212464  ;;  %v1504_v55 = vshll.u32 %v1464_v1, 8  ;;  %v1312_v58 = vxor.u32 2147483648, %v2187_v22  ;;  %vm1489_vm13 = vcmp.lt.s32.totalorder %v3450_v60, 2 }
 0x13a   :  { %v1496_v16 = vsel %vm1488_vm10, %v1475_v21, %v1478_v47  ;;  %v1675_v44 = vand.u32 2139095040, %v3478_v56  ;;  %vm1305_vm14 = vweird.f32 %v3129_v13  ;;  %v1407_v34 = vmul.f32 %v1406_v15, %v1404_v45  ;;  %v3501_v24 = vpop.eup %2190 }
 0x13b   :  { %v1492_v8 = vsel %vm1488_vm10, %v1472_v57, %v1475_v21  ;;  %v1494_v11 = vsel %vm1490_vm9, %v1478_v47, %v1493_v30  ;;  %v1497_v46 = vsel %vm1491_vm12, %v1484_v10, 920167782  ;;  %v1309_v7 = vxor.u32 2147483648, %v2189_v53 }
 0x13c   :  { %v1498_v9 = vsel %vm1490_vm9, %v1481_v51, %v1497_v46  ;;  %v1500_v61 = vsel %vm1488_vm10, %v1478_v47, %v1481_v51  ;;  %v1501_v6 = vsel %vm1491_vm12, %v1487_v40, 1326507024  ;;  %v1408_v37 = vxor.u32 2147483648, %v1407_v34 }
 0x13d   :  { %v1499_v1 = vsel %vm1489_vm13, %v1496_v16, %v1498_v9  ;;  %v1502_v49 = vsel %vm1490_vm9, %v1484_v10, %v1501_v6  ;;  %v1786_v19 = vand.u32 2139095040, %v3467_v48  ;;  %v1495_v0 = vsel %vm1489_vm13, %v1492_v8, %v1494_v11 }
 0x13e   :  { %v1503_v23 = vsel %vm1489_vm13, %v1500_v61, %v1502_v49  ;;  %v3518_v57 = vmul.u32.u64.low %v1504_v55, %v1499_v1  ;;  %v3519_v21 = vmul.u32.u64.high %v1504_v55, %v1499_v1, %v3518_v57  ;;  %v1409_v47 = vsel %vm1326_vm4, %v1408_v37, %v1407_v34 }
 0x13f   :  { %v3523_v51 = vmul.u32.u64.low %v1504_v55, %v1503_v23  ;;  %v3524_v20 = vmul.u32.u64.high %v1504_v55, %v1503_v23, %v3523_v51  ;;  %v1672_v15 = vand.u32 2147483647, %v3478_v56  ;;  %v1310_v10 = vsel %vm1308_vm0, %v2187_v22, %v1309_v7 }
 0x140   :  { %v1313_v40 = vsel %vm1311_vm7, %v1312_v58, %v2189_v53  ;;  %v1412_v60 = vsel %vm3473_vm8, %v3159_v42, %v1409_v47  ;;  %v1676_v45 = vshrl.u32 %v1675_v44, 23  ;;  %v1413_v30 = vsel %vm3473_vm8, 0, %v3464_v54 }
 0x141   :  { %2192 = vcosq.f32 %v1412_v60  ;;  %v1511_v16 = vmul.u32 %v1504_v55, %v1495_v0  ;;  %v1787_v34 = vshrl.u32 %v1786_v19, 23  ;;  %v1440_v8 = vmul.f32 %v3501_v24, %v1439_v59 }
 0x142   :  { %2194 = vsinq.f32 %v1412_v60  ;;  %v1514_v22 = vadd.s32 1, %v3519_v21  ;;  %v2076_v11 = vadd.s32 4294967169, %v1676_v45  ;;  %v1314_v53 = vsel %vm1307_vm11, %v1310_v10, %v1313_v40 }
 0x143   :  { %vm1513_vm15 = vc.u32 %v3524_v20, %v3518_v57  ;;  %v1679_v58 = vand.u32 8388607, %v1672_v15  ;;  %v1790_v54 = vand.u32 8388607, %v1783_v38  ;;  %v3546_v25 = vand.u32 3, %v1413_v30 }
 0x144   :  { %v1515_v55 = vsel %vm1513_vm15, %v1514_v22, %v3519_v21  ;;  %v1682_v44 = vadd.s32 1, %v2076_v11  ;;  %v2081_v59 = vadd.s32 4294967169, %v1787_v34  ;;  %v3551_v46 = vadd.f32 %v3433_v12, %v3416_v5 }
 0x145   :  { %v1516_v3 = vadd.s32 %v1515_v55, %v1511_v16  ;;  %v1315_v7 = vsel %vm1305_vm14, nan, %v1314_v53  ;;  %v3557_v9 = vmul.f32 %v3439_v63, %v3425_v14  ;;  %v1441_v61 = vsub.f32 1.25, %v1440_v8 }
 0x146   :  { %vm1683_vm1 = vcmp.gt.s32.totalorder %v1682_v44, 0  ;;  %v1680_v37 = vor.u32 8388608, %v1679_v58  ;;  %v1791_v49 = vor.u32 8388608, %v1790_v54  ;;  %v1322_v19 = vsub.f32 %v3436_v50, %v3444_v39 }
 0x147   :  { %v1517_v6 = vadd.s32 536870912, %v1516_v3  ;;  %v1684_v1 = vsel %vm1683_vm1, %v1682_v44, 0  ;;  %vm1418_vm2 = vcmp.lt.s32.totalorder %v3546_v25, 2  ;;  %v1793_v12 = vadd.s32 1, %v2081_v59 }
 0x148   :  { %v1686_v5 = vand.u32 31, %v1684_v1  ;;  %vm1416_vm3 = vweird.f32 %v3159_v42  ;;  %vm1419_vm4 = vcmp.eq.s32.totalorder %v3546_v25, 0  ;;  %vm1422_vm5 = vcmp.eq.s32.totalorder %v3546_v25, 2 }
 0x149   :  { %v3567_v13 = vmul.f32 %v3501_v24, %v3441_v2  ;;  %v3569_v14 = vshrl.u32 %v1517_v6, 30  ;;  %v3571_v63 = vmul.f32 4.9, %v1315_v7  ;;  %2196 = vrcp.f32 %v1441_v61 }
 0x14a   :  { %v3574_v0 = vadd.s32 %v3518_v57, %v3524_v20  ;;  %v1687_v23 = vsub.s32 32, %v1686_v5  ;;  %v3577_v47 = vshll.u32 %v1680_v37, 8  ;;  %v3579_v51 = vshll.u32 %v1791_v49, 8 }
 0x14b   :  { %v1519_v21 = vshll.u32 %v3569_v14, 30  ;;  %v3582_v10 = vmul.f32 2.0, %v3051_v4  ;;  %v1689_v40 = vshll.u32 %v2399_v27, %v1686_v5  ;;  %vm1794_vm6 = vcmp.gt.s32.totalorder %v1793_v12, 0 }
 0x14c   :  { %v3586_v60 = vmul.f32 2.0, %v3395_v36  ;;  %v3589_v45 = vmul.f32 2.0, %v3373_v18  ;;  %v1690_v20 = vshrl.u32 %v2400_v29, %v1687_v23  ;;  %v1692_v30 = vshll.u32 %v2400_v29, %v1686_v5 }
 0x14d   :  { %v3591_v57 = vsub.s32 %v1516_v3, %v1519_v21  ;;  %v1695_v16 = vshll.u32 %v2401_v31, %v1686_v5  ;;  %v1693_v4 = vshrl.u32 %v2401_v31, %v1687_v23  ;;  %v1696_v8 = vshrl.u32 %v2402_v33, %v1687_v23 }
 0x14e   :  { %v2193_v34 = vpop.eup %2192  ;;  %v1698_v22 = vshll.u32 %v2402_v33, %v1686_v5  ;;  %v1699_v36 = vshrl.u32 %v2403_v35, %v1687_v23  ;;  %v1685_v58 = vshrl.u32 %v1684_v1, 5  ;;  %v3602_v54 = vmul.f32 2.0, %v3324_v32 }
 0x14f   :  { %v2195_v11 = vpop.eup %2194  ;;  %v1423_v18 = vxor.u32 2147483648, %v2193_v34  ;;  %v1522_v53 = vsub.s32 0, %v3591_v57  ;;  %v1701_v44 = vshll.u32 %v2403_v35, %v1686_v5  ;;  %v1702_v59 = vshrl.u32 %v2404_v43, %v1687_v23 }
 0x150   :  { %v1420_v55 = vxor.u32 2147483648, %v2195_v11  ;;  %v1795_v3 = vsel %vm1794_vm6, %v1793_v12, 0  ;;  %v1688_v6 = vshrl.u32 %v2399_v27, %v1687_v23  ;;  %v1691_v37 = vor.u32 %v1690_v20, %v1689_v40 }
 0x151   :  { %v1424_v7 = vsel %vm1422_vm5, %v1423_v18, %v2195_v11  ;;  %v2068_v61 = vmin.u32 %v1522_v53, %v3591_v57  ;;  %v1694_v32 = vor.u32 %v1693_v4, %v1692_v30  ;;  %v1697_v49 = vor.u32 %v1696_v8, %v1695_v16 }
 0x152   :  { %v1421_v1 = vsel %vm1419_vm4, %v2193_v34, %v1420_v55  ;;  %v1700_v21 = vor.u32 %v1699_v36, %v1698_v22  ;;  %vm1458_vm0 = vcmp.lt.s32.totalorder %v3387_v52, 0  ;;  %vm1704_vm7 = vcmp.lt.s32.totalorder %v1685_v58, 1 }
 0x153   :  { %v1425_v5 = vsel %vm1418_vm2, %v1421_v1, %v1424_v7  ;;  %v1524_v12 = vclz %v2068_v61  ;;  %vm1707_vm8 = vcmp.lt.s32.totalorder %v1685_v58, 4  ;;  %v1703_v18 = vor.u32 %v1702_v59, %v1701_v44 }
 0x154   :  { %v1426_v11 = vsel %vm1416_vm3, nan, %v1425_v5  ;;  %vm1706_vm10 = vcmp.lt.s32.totalorder %v1685_v58, 3  ;;  %v3618_v23 = vand.u32 31, %v1795_v3  ;;  %vm1705_vm11 = vcmp.lt.s32.totalorder %v1685_v58, 2 }
 0x155   :  { %v1427_v40 = vmul.f32 14.7, %v1426_v11  ;;  %v2069_v20 = vadd.s32 4294967294, %v1524_v12  ;;  %v1709_v30 = vsel %vm1707_vm8, %v1697_v49, 2102212464  ;;  %v1542_v16 = vsub.s32 4, %v3569_v14 }
 0x156   :  { %vm3623_vm12 = vcmp.le.f32.partialorder %v1456_v28, 0.7853982  ;;  %v1708_v42 = vsel %vm1704_vm7, %v1688_v6, %v1691_v37  ;;  %v1712_v34 = vsel %vm1704_vm7, %v1691_v37, %v1694_v32  ;;  %v1713_v4 = vsel %vm1707_vm8, %v1700_v21, 920167782  ;;  %v2197_v8 = vpop.eup %2196 }
 0x157   :  { %v1428_v22 = vadd.f32 %v1427_v40, %v1322_v19  ;;  %vm2070_vm9 = vcmp.lt.s32.totalorder %v2069_v20, 0  ;;  %v1710_v36 = vsel %vm1706_vm10, %v1694_v32, %v1709_v30  ;;  %v1714_v28 = vsel %vm1706_vm10, %v1697_v49, %v1713_v4  ;;  %v3662_v40 = vld [vmem:[%s3895_s4] sm:$0xff]  ;;  %s2406_s4 = smov [#allocation11]  }
 0x158   :  { %v1527_v53 = vsel %vm2070_vm9, 0, %v2069_v20  ;;  %v1715_v55 = vsel %vm1705_vm11, %v1712_v34, %v1714_v28  ;;  %v1716_v44 = vsel %vm1704_vm7, %v1694_v32, %v1697_v49  ;;  %v1717_v59 = vsel %vm1707_vm8, %v1703_v18, 1326507024  ;;  %s1971_s25 = sshll.u32 %s2406_s4, 4  ;;  %s1972_s25 = int_to_ptr.vmem [resolvable:$true] %s1971_s25 }
 0x159   :  { %v1429_v7 = vadd.f32 %v1428_v22, %v3571_v63  ;;  %v1528_v61 = vsub.s32 32, %v1527_v53  ;;  %v1529_v6 = vshll.u32 %v3591_v57, %v1527_v53  ;;  %v1532_v37 = vsub.s32 4294967266, %v1527_v53  ;;  %s2303_s26 = scalar_lea.vmem %s1972_s25, 128  ;;  %p2308_p7 = scmp.lt.s32.totalorder %s1972_s25, %s1972_s25 }
 0x15a   :  { %v1711_v50 = vsel %vm1705_vm11, %v1708_v42, %v1710_v36  ;;  %v1718_v39 = vsel %vm1706_vm10, %v1700_v21, %v1717_v59  ;;  %v3644_v19 = vmul.u32.u64.low %v3577_v47, %v1715_v55  ;;  %v3645_v1 = vmul.u32.u64.high %v3577_v47, %v1715_v55, %v3644_v19  ;;  %p2304_p6 = scmp.ne.s32.totalorder %s1972_s25, %s2303_s26  ;;  %p2309_p8 = scmp.lt.s32.totalorder %s2303_s26, %s2303_s26 }
 0x15b   :  { %v1432_v5 = vmul.f32 %v3567_v13, %v1429_v7  ;;  %v1530_v32 = vshrl.u32 %v3574_v0, %v1528_v61  ;;  %v1533_v49 = vadd.s32 127, %v1532_v37  ;;  %v1719_v12 = vsel %vm1705_vm11, %v1716_v44, %v1718_v39 }
 0x15c   :  { %v1543_v57 = vsel %vm1458_vm0, %v1542_v16, %v3569_v14  ;;  %v3655_v11 = vmul.u32.u64.low %v3577_v47, %v1719_v12  ;;  %v3656_v18 = vmul.u32.u64.high %v3577_v47, %v1719_v12, %v3655_v11  ;;  %v1798_v21 = vsub.s32 32, %v3618_v23  ;;  %p2310_p9 = por %p2309_p8, %p2308_p7 }
 0x15d   :  { %v1433_v13 = vadd.f32 %v3662_v40, %v1432_v5  ;;  %v1531_v0 = vor.u32 %v1530_v32, %v1529_v6  ;;  %v1534_v58 = vshll.u32 %v1533_v49, 23  ;;  %v1908_v20 = vadd.f32 %v3392_v41, %v3582_v10 }
 0x15e   :  { %v1727_v14 = vmul.u32 %v3577_v47, %v1711_v50  ;;  %v1730_v30 = vadd.s32 1, %v3645_v1  ;;  %v3669_v16 = vshrl.u32 %v1795_v3, 5  ;;  %v3673_v42 = vadd.f32 %v3589_v45, %v3027_v62  ;;  %p2311_p10 = pnand %p2310_p9, %p2304_p6 }
 0x15f   :  { %v1437_v34 = vsub.f32 %v1433_v13, %v3557_v9  ;;  %v1535_v4 = vor.u32 4788187, %v1534_v58  ;;  %v1538_v22 = vcvt.s32.f32 %v1531_v0  ;;  %v1545_v36 = vsel %vm3623_vm12, 0, %v1543_v57 }
 0x160   :  { %v1652_v28 = vadd.s32 3, %v1545_v36  ;;  %vm1729_vm13 = vc.u32 %v3656_v18, %v3644_v19  ;;  %v1800_v47 = vshll.u32 %v2399_v27, %v3618_v23  ;;  %v1801_v10 = vshrl.u32 %v2400_v29, %v1798_v21 }
 0x161   :  { %v1438_v3 = vsub.f32 %v1437_v34, %v3571_v63  ;;  %v1536_v62 = vand.u32 2147483647, %v1535_v4  ;;  %v1731_v45 = vsel %vm1729_vm13, %v1730_v30, %v3645_v1  ;;  %v1803_v9 = vshll.u32 %v2400_v29, %v3618_v23 }
 0x162   :  { %v1732_v53 = vadd.s32 %v1731_v45, %v1727_v14  ;;  %v1804_v55 = vshrl.u32 %v2401_v31, %v1798_v21  ;;  %v1806_v44 = vshll.u32 %v2401_v31, %v3618_v23  ;;  %v1807_v59 = vshrl.u32 %v2402_v33, %v1798_v21 }
 0x163   :  { %v3691_v61 = vmul.f32 %v2197_v8, %v1438_v3  ;;  %v1539_v6 = vmul.f32 %v1538_v22, %v1536_v62  ;;  %v1809_v63 = vshll.u32 %v2402_v33, %v3618_v23  ;;  %v3696_v37 = vadd.f32 %v3586_v60, %v1908_v20 }
 0x164   :  { %v1733_v50 = vadd.s32 536870912, %v1732_v53  ;;  %v1810_v29 = vshrl.u32 %v2403_v35, %v1798_v21  ;;  %v1812_v39 = vshll.u32 %v2403_v35, %v3618_v23  ;;  %v1813_v1 = vshrl.u32 %v2404_v43, %v1798_v21 }
 0x165   :  { %v1454_v31 = vmul.f32 0.2, %v3691_v61  ;;  %v1444_v8 = vmul.f32 %v3691_v61, %v3441_v2  ;;  %v1540_v5 = vxor.u32 2147483648, %v1539_v6  ;;  %v3705_v32 = vand.u32 3, %v1652_v28 }
 0x166   :  { %v3707_v33 = vshrl.u32 %v1733_v50, 30  ;;  %v1802_v60 = vor.u32 %v1801_v10, %v1800_v47  ;;  %v1805_v49 = vor.u32 %v1804_v55, %v1803_v9  ;;  %v1808_v12 = vor.u32 %v1807_v59, %v1806_v44 }
 0x167   :  { %v3710_v57 = vadd.f32 %v3366_v17, %v1454_v31  ;;  %v1445_v11 = vadd.f32 %v1444_v8, %v1429_v7  ;;  %v1541_v35 = vsel %vm1458_vm0, %v1540_v5, %v1539_v6  ;;  %vm1815_vm14 = vcmp.lt.s32.totalorder %v3669_v16, 1 }
 0x168   :  { %v1544_v43 = vsel %vm3623_vm12, %v3387_v52, %v1541_v35  ;;  %v1735_v2 = vshll.u32 %v3707_v33, 30  ;;  %v1811_v23 = vor.u32 %v1810_v29, %v1809_v63  ;;  %v1814_v13 = vor.u32 %v1813_v1, %v1812_v39 }
 0x169   :  { %v1918_v0 = vadd.f32 %v3551_v46, %v3710_v57  ;;  %v1446_v58 = vsub.f32 0.0, %v1445_v11  ;;  %2198 = vcosq.f32 %v1544_v43  ;;  %vm1818_vm15 = vcmp.lt.s32.totalorder %v3669_v16, 4 }
 0x16a   :  { %2200 = vsinq.f32 %v1544_v43  ;;  %v3722_v17 = vsub.s32 %v1732_v53, %v1735_v2  ;;  %v1799_v7 = vshrl.u32 %v2399_v27, %v1798_v21  ;;  %vm1817_vm1 = vcmp.lt.s32.totalorder %v3669_v16, 3  ;;  %v2219_v21 = vld [vmem:[#allocation5] sm:$0xff] }
 0x16b   :  { %v1919_v25 = vmul.f32 0.033333335, %v1918_v0  ;;  %v1447_v20 = vmul.f32 %v3501_v24, %v1446_v58  ;;  %vm1816_vm2 = vcmp.lt.s32.totalorder %v3669_v16, 2  ;;  %v1820_v14 = vsel %vm1818_vm15, %v1808_v12, 2102212464 }
 0x16c   :  { %v1738_v46 = vsub.s32 0, %v3722_v17  ;;  %v1823_v30 = vsel %vm1815_vm14, %v1802_v60, %v1805_v49  ;;  %v1824_v34 = vsel %vm1818_vm15, %v1811_v23, 920167782  ;;  %v1827_v27 = vsel %vm1815_vm14, %v1805_v49, %v1808_v12 }
 0x16d   :  { %v1920_v4 = vadd.f32 %v2219_v21, %v1919_v25  ;;  %v1452_v22 = vmul.f32 0.2, %v1447_v20  ;;  %v1825_v24 = vsel %vm1817_vm1, %v1808_v12, %v1824_v34  ;;  %v1828_v28 = vsel %vm1818_vm15, %v1814_v13, 1326507024 }
 0x16e   :  { %v3741_v47 = vand.u32 3, %v1545_v36  ;;  %v2077_v10 = vmin.u32 %v1738_v46, %v3722_v17  ;;  %v1819_v3 = vsel %vm1815_vm14, %v1799_v7, %v1802_v60  ;;  %v1821_v62 = vsel %vm1817_vm1, %v1805_v49, %v1820_v14 }
 0x16f   :  { %vm1942_vm3 = vcmp.gt.f32.partialorder %v1920_v4, 3.1415927  ;;  %v3749_v45 = vadd.f32 %v3392_v41, %v1452_v22  ;;  %vm1655_vm4 = vcmp.eq.s32.totalorder %v3705_v32, 0  ;;  %v1826_v9 = vsel %vm1816_vm2, %v1823_v30, %v1825_v24 }
 0x170   :  { %v1829_v36 = vsel %vm1817_vm1, %v1811_v23, %v1828_v28  ;;  %v2405_v53 = vmov 0.0   ;;  %vm1658_vm5 = vcmp.eq.s32.totalorder %v3705_v32, 2  ;;  %v1740_v44 = vclz %v2077_v10 }
 0x171   :  { %v1943_v55 = vsel %vm1942_vm3, 6.2831855, %v2405_v53  ;;  %v1830_v59 = vsel %vm1816_vm2, %v1827_v27, %v1829_v36  ;;  %v3762_v41 = vmul.f32 %v3710_v57, %v3749_v45  ;;  %vm1551_vm6 = vcmp.eq.s32.totalorder %v3741_v47, 0 }
 0x172   :  { %v1944_v6 = vsub.f32 %v1920_v4, %v1943_v55  ;;  %v3765_v63 = vmul.u32.u64.low %v3579_v51, %v1830_v59  ;;  %v3766_v50 = vmul.u32.u64.high %v3579_v51, %v1830_v59, %v3765_v63  ;;  %vm1554_vm0 = vcmp.eq.s32.totalorder %v3741_v47, 2 }
 0x173   :  { %v2078_v29 = vadd.s32 4294967294, %v1740_v44  ;;  %v1822_v39 = vsel %vm1816_vm2, %v1819_v3, %v1821_v62  ;;  %v3773_v1 = vmul.u32.u64.low %v3579_v51, %v1826_v9  ;;  %v3774_v31 = vmul.u32.u64.high %v3579_v51, %v1826_v9, %v3773_v1 }
 0x174   :  { %vm1945_vm7 = vcmp.lt.f32.partialorder %v1944_v6, -3.1415927  ;;  %v1911_v8 = vadd.f32 %v3696_v37, %v3749_v45  ;;  %v1923_v5 = vmul.f32 2.0, %v1447_v20  ;;  %v1929_v60 = vadd.f32 %v3602_v54, %v2966_v26 }
 0x175   :  { %v1946_v49 = vsel %vm1945_vm7, 6.2831855, %v2405_v53  ;;  %vm2079_vm8 = vcmp.lt.s32.totalorder %v2078_v29, 0  ;;  %v1776_v16 = vmul.f32 -0.5, %v3710_v57  ;;  %v1930_v12 = vmul.f32 2.0, %v3691_v61 }
 0x176   :  { %v1947_v11 = vadd.f32 %v1946_v49, %v1944_v6  ;;  %v1743_v35 = vsel %vm2079_vm8, 0, %v2078_v29  ;;  %v1838_v43 = vmul.u32 %v3579_v51, %v1822_v39  ;;  %vm1840_vm10 = vc.u32 %v3766_v50, %v3773_v1  ;;  %v2199_v37 = vpop.eup %2198 }
 0x177   :  { %v1728_v2 = vadd.s32 %v3644_v19, %v3656_v18  ;;  %v1744_v26 = vsub.s32 32, %v1743_v35  ;;  %v1748_v54 = vsub.s32 4294967266, %v1743_v35  ;;  %v1841_v23 = vadd.s32 1, %v3774_v31  ;;  %v2201_v13 = vpop.eup %2200 }
 0x178   :  { %1948 = vst [vmem:[#allocation11] sm:$0xff] %v1947_v11  ;;  %v1555_v0 = vxor.u32 2147483648, %v2199_v37  ;;  %v1912_v61 = vmul.f32 0.033333335, %v1911_v8  ;;  %v3791_v58 = vadd.f32 %v1923_v5, %v3673_v42  ;;  %v3793_v51 = vadd.f32 %v1930_v12, %v1929_v60 }
 0x179   :  { %v1552_v7 = vxor.u32 2147483648, %v2201_v13  ;;  %vm1654_vm11 = vcmp.lt.s32.totalorder %v3705_v32, 2  ;;  %v1749_v25 = vadd.s32 127, %v1748_v54  ;;  %v1842_v19 = vsel %vm1840_vm10, %v1841_v23, %v3774_v31 }
 0x17a   :  { %2314 = shalt.err (!%p2311_p10)
}
 0x17b   :  { %1974 = dma.vmem_to_hbm [thread:$0]  %s1972_s25, 128, %s3897_s6, [#allocation12]   ;;  %v1660_v18 = vsel %vm1658_vm5, %v1555_v0, %v2201_v13  ;;  %v1777_v42 = vmul.f32 %v1776_v16, %v3710_v57  ;;  %v1843_v20 = vadd.s32 %v1842_v19, %v1838_v43  ;;  %v2220_v14 = vld [vmem:[#allocation2] sm:$0xff]  ;;  %v1657_v30 = vsel %vm1655_vm4, %v2199_v37, %v1552_v7 }
 0x17c   :  { %v1913_v46 = vadd.f32 %v2220_v14, %v1912_v61  ;;  %v1745_v34 = vshll.u32 %v3722_v17, %v1743_v35  ;;  %v1746_v27 = vshrl.u32 %v1728_v2, %v1744_v26  ;;  %v1750_v21 = vshll.u32 %v1749_v25, 23  ;;  %s2407_s6 = smov [#allocation10]  }
 0x17d   :  { %vm1548_vm12 = vweird.f32 %v3387_v52  ;;  %v1661_v4 = vsel %vm1654_vm11, %v1657_v30, %v1660_v18  ;;  %v1844_v22 = vadd.s32 536870912, %v1843_v20  ;;  %vm1550_vm13 = vcmp.lt.s32.totalorder %v3741_v47, 2  ;;  %s1961_s29 = sshll.u32 %s2407_s6, 4  ;;  %s1962_s29 = int_to_ptr.vmem [resolvable:$true] %s1961_s29 }
 0x17e   :  { %vm1935_vm9 = vcmp.gt.f32.partialorder %v1913_v46, 3.1415927  ;;  %v3815_v57 = vsel %vm1548_vm12, nan, %v1661_v4  ;;  %v1553_v24 = vsel %vm1551_vm6, %v2199_v37, %v1552_v7  ;;  %v1556_v17 = vsel %vm1554_vm0, %v1555_v0, %v2201_v13  ;;  %s2323_s30 = scalar_lea.vmem %s1962_s29, 128  ;;  %p2328_p12 = scmp.lt.s32.totalorder %s1962_s29, %s1962_s29 }
 0x17f   :  { %v3822_v28 = vmul.f32 %v1777_v42, %v3815_v57  ;;  %v3826_v32 = vmul.f32 %v3762_v41, %v3815_v57  ;;  %v1747_v10 = vor.u32 %v1746_v27, %v1745_v34  ;;  %v1751_v3 = vor.u32 4788187, %v1750_v21  ;;  %p2324_p11 = scmp.ne.s32.totalorder %s1962_s29, %s2323_s30  ;;  %p2329_p13 = scmp.lt.s32.totalorder %s2323_s30, %s2323_s30 }
 0x180   :  { %v3828_v62 = vshrl.u32 %v1844_v22, 30  ;;  %v1936_v9 = vsel %vm1935_vm9, 6.2831855, %v2405_v53  ;;  %v1557_v44 = vsel %vm1550_vm13, %v1553_v24, %v1556_v17 }
 0x181   :  { %v1781_v36 = vsub.f32 %v3822_v28, %v3826_v32  ;;  %v1937_v55 = vsub.f32 %v1913_v46, %v1936_v9  ;;  %v1752_v59 = vand.u32 2147483647, %v1751_v3  ;;  %v1754_v6 = vcvt.s32.f32 %v1747_v10  ;;  %p2330_p0 = por %p2329_p13, %p2328_p12 }
 0x182   :  { %v1846_v47 = vshll.u32 %v3828_v62, 30  ;;  %v1558_v31 = vsel %vm1548_vm12, nan, %v1557_v44 }
 0x183   :  { %vm1938_vm14 = vcmp.lt.f32.partialorder %v1937_v55, -3.1415927  ;;  %v1755_v8 = vmul.f32 %v1754_v6, %v1752_v59  ;;  %p2331_p1 = pnand %p2330_p0, %p2324_p11 }
 0x184   :  { %v1847_v41 = vsub.s32 %v1843_v20, %v1846_v47  ;;  %v1939_v63 = vsel %vm1938_vm14, 6.2831855, %v2405_v53 }
 0x185   :  { %v1940_v29 = vadd.f32 %v1939_v63, %v1937_v55 }
 0x186   :  { %v1849_v39 = vsub.s32 0, %v1847_v41 }
 0x187   :  { %1941 = vst [vmem:[#allocation10] sm:$0xff] %v1940_v29 }
 0x188   :  { %v2082_v5 = vmin.u32 %v1849_v39, %v1847_v41 }
 0x189   :  { %2334 = shalt.err (!%p2331_p1)
}
 0x18a   :  { %1964 = dma.vmem_to_hbm [thread:$0]  %s1962_s29, 128, %s3896_s5, [#allocation4]   ;;  %v1663_v53 = vadd.f32 1.25, %v1558_v31  ;;  %v1851_v60 = vclz %v2082_v5  ;;  %v1756_v49 = vxor.u32 2147483648, %v1755_v8  ;;  %vm1674_vm15 = vcmp.lt.s32.totalorder %v3478_v56, 0  ;;  %v2221_v32 = vld [vmem:[#allocation8] sm:$0xff] }
 0x18b   :  { %v1839_v12 = vadd.s32 %v3773_v1, %v3766_v50  ;;  %vm3845_vm2 = vcmp.le.f32.partialorder %v1672_v15, 0.7853982  ;;  %v1667_v19 = vmul.f32 0.5, %v1558_v31  ;;  %v1758_v18 = vsub.s32 4, %v3707_v33  ;;  %s2408_s5 = smov [#allocation14]  }
 0x18c   :  { %v2083_v16 = vadd.s32 4294967294, %v1851_v60  ;;  %v1664_v52 = vadd.f32 0.25, %v1663_v53  ;;  %v1757_v43 = vsel %vm1674_vm15, %v1756_v49, %v1755_v8  ;;  %vm1785_vm3 = vcmp.lt.s32.totalorder %v3467_v48, 0  ;;  %s1991_s11 = sshll.u32 %s2408_s5, 4  ;;  %s1992_s11 = int_to_ptr.vmem [resolvable:$true] %s1991_s11 }
 0x18d   :  { %v1760_v50 = vsel %vm3845_vm2, %v3478_v56, %v1757_v43  ;;  %vm3858_vm4 = vcmp.le.f32.partialorder %v1783_v38, 0.7853982  ;;  %v1668_v46 = vadd.f32 0.25, %v1667_v19  ;;  %v1759_v30 = vsel %vm1674_vm15, %v1758_v18, %v3707_v33  ;;  %s2343_s12 = scalar_lea.vmem %s1992_s11, 128  ;;  %p2348_p3 = scmp.lt.s32.totalorder %s1992_s11, %s1992_s11 }
 0x18e   :  { %vm2084_vm1 = vcmp.lt.s32.totalorder %v2083_v16, 0  ;;  %v1665_v54 = vadd.f32 1.0, %v1664_v52  ;;  %2202 = vcosq.f32 %v1760_v50  ;;  %v1869_v27 = vsub.s32 4, %v3828_v62  ;;  %p2344_p2 = scmp.ne.s32.totalorder %s1992_s11, %s2343_s12  ;;  %p2349_p4 = scmp.lt.s32.totalorder %s2343_s12, %s2343_s12 }
 0x18f   :  { %v1854_v35 = vsel %vm2084_vm1, 0, %v2083_v16  ;;  %2204 = vsinq.f32 %v1760_v50  ;;  %v1761_v38 = vsel %vm3845_vm2, 0, %v1759_v30  ;;  %v1669_v4 = vadd.f32 1.0, %v1668_v46 }
 0x190   :  { %v1855_v37 = vsub.s32 32, %v1854_v35  ;;  %v1856_v2 = vshll.u32 %v1847_v41, %v1854_v35  ;;  %v1859_v26 = vsub.s32 4294967266, %v1854_v35  ;;  %v1666_v15 = vadd.f32 1.0, %v1665_v54  ;;  %p2350_p5 = por %p2349_p4, %p2348_p3 }
 0x191   :  { %v1870_v24 = vsel %vm1785_vm3, %v1869_v27, %v3828_v62  ;;  %v1765_v10 = vand.u32 3, %v1761_v38  ;;  %v1898_v3 = vmul.f32 %v1669_v4, %v1669_v4  ;;  %vm1764_vm7 = vweird.f32 %v3478_v56 }
 0x192   :  { %v1857_v23 = vshrl.u32 %v1839_v12, %v1855_v37  ;;  %v1860_v13 = vadd.s32 127, %v1859_v26  ;;  %2206 = vrcp.f32 %v1666_v15  ;;  %v1872_v33 = vsel %vm3858_vm4, 0, %v1870_v24  ;;  %p2351_p6 = pnand %p2350_p5, %p2344_p2 }
 0x193   :  { %vm1767_vm5 = vcmp.eq.s32.totalorder %v1765_v10, 0  ;;  %vm1770_vm6 = vcmp.eq.s32.totalorder %v1765_v10, 2  ;;  %v1876_v44 = vand.u32 3, %v1872_v33  ;;  %vm1766_vm0 = vcmp.lt.s32.totalorder %v1765_v10, 2 }
 0x194   :  { %v1858_v1 = vor.u32 %v1857_v23, %v1856_v2  ;;  %v1861_v0 = vshll.u32 %v1860_v13, 23  ;;  %vm1875_vm12 = vweird.f32 %v3467_v48  ;;  %v1893_v16 = vmul.f32 0.5, %v3749_v45 }
 0x195   :  { %vm1881_vm8 = vcmp.eq.s32.totalorder %v1876_v44, 2  ;;  %vm1878_vm10 = vcmp.eq.s32.totalorder %v1876_v44, 0  ;;  %vm1877_vm11 = vcmp.lt.s32.totalorder %v1876_v44, 2 }
 0x196   :  { %v1862_v61 = vor.u32 4788187, %v1861_v0  ;;  %v1865_v7 = vcvt.s32.f32 %v1858_v1  ;;  %v1894_v43 = vmul.f32 %v1893_v16, %v3749_v45 }
 0x198   :  { %v1863_v25 = vand.u32 2147483647, %v1862_v61 }
 0x19a   :  { %v1866_v42 = vmul.f32 %v1865_v7, %v1863_v25 }
 0x19b   :  { %v2203_v22 = vpop.eup %2202 }
 0x19c   :  { %v1867_v14 = vxor.u32 2147483648, %v1866_v42  ;;  %v2205_v17 = vpop.eup %2204  ;;  %v1771_v47 = vxor.u32 2147483648, %v2203_v22 }
 0x19d   :  { %v1768_v55 = vxor.u32 2147483648, %v2205_v17 }
 0x19e   :  { %v1868_v34 = vsel %vm1785_vm3, %v1867_v14, %v1866_v42  ;;  %v1772_v41 = vsel %vm1770_vm6, %v1771_v47, %v2205_v17 }
 0x19f   :  { %v1871_v21 = vsel %vm3858_vm4, %v3467_v48, %v1868_v34  ;;  %v2207_v9 = vpop.eup %2206  ;;  %v1769_v6 = vsel %vm1767_vm5, %v2203_v22, %v1768_v55  ;;  %v1895_v48 = vmul.f32 %v1894_v43, %v3815_v57 }
 0x1a0   :  { %2208 = vcosq.f32 %v1871_v21  ;;  %v1899_v59 = vmul.f32 %v2207_v9, %v1898_v3  ;;  %v1773_v29 = vsel %vm1766_vm0, %v1769_v6, %v1772_v41  ;;  %v1890_v35 = vmul.f32 %v2207_v9, %v1669_v4 }
 0x1a1   :  { %2210 = vsinq.f32 %v1871_v21  ;;  %v1774_v53 = vsel %vm1764_vm7, nan, %v1773_v29 }
 0x1a2   :  { %v1900_v31 = vsub.f32 1.25, %v1899_v59  ;;  %v1775_v12 = vmul.f32 4.9, %v1774_v53 }
 0x1a4   :  { %2212 = vrcp.f32 %v1900_v31 }
 0x1ad   :  { %v2209_v63 = vpop.eup %2208 }
 0x1ae   :  { %v2211_v62 = vpop.eup %2210  ;;  %v1882_v39 = vxor.u32 2147483648, %v2209_v63 }
 0x1af   :  { %v1879_v8 = vxor.u32 2147483648, %v2211_v62 }
 0x1b0   :  { %v1883_v5 = vsel %vm1881_vm8, %v1882_v39, %v2211_v62 }
 0x1b1   :  { %v1880_v60 = vsel %vm1878_vm10, %v2209_v63, %v1879_v8  ;;  %v2213_v23 = vpop.eup %2212 }
 0x1b2   :  { %v1884_v49 = vsel %vm1877_vm11, %v1880_v60, %v1883_v5 }
 0x1b3   :  { %v1885_v52 = vsel %vm1875_vm12, nan, %v1884_v49 }
 0x1b4   :  { %v1886_v56 = vmul.f32 14.7, %v1885_v52 }
 0x1b6   :  { %v1887_v11 = vadd.f32 %v1886_v56, %v1781_v36 }
 0x1b8   :  { %v1888_v37 = vadd.f32 %v1887_v11, %v1775_v12 }
 0x1ba   :  { %v1891_v2 = vmul.f32 %v1890_v35, %v1888_v37 }
 0x1bc   :  { %v1892_v26 = vadd.f32 %v3662_v40, %v1891_v2 }
 0x1be   :  { %v1896_v54 = vsub.f32 %v1892_v26, %v1895_v48 }
 0x1c0   :  { %v1897_v13 = vsub.f32 %v1896_v54, %v1775_v12 }
 0x1c2   :  { %v1902_v50 = vmul.f32 %v2213_v23, %v1897_v13 }
 0x1c4   :  { %v1903_v1 = vmul.f32 %v1902_v50, %v1669_v4  ;;  %v1932_v0 = vadd.f32 %v3793_v51, %v1902_v50 }
 0x1c6   :  { %v1904_v15 = vadd.f32 %v1903_v1, %v1888_v37  ;;  %v1933_v61 = vmul.f32 0.033333335, %v1932_v0 }
 0x1c8   :  { %v1905_v28 = vsub.f32 0.0, %v1904_v15  ;;  %v1934_v45 = vadd.f32 %v2221_v32, %v1933_v61 }
 0x1ca   :  { %v1906_v36 = vmul.f32 %v2207_v9, %v1905_v28  ;;  %v2086_v7 = vclamps-f32 %v1934_v45, 28.274334 }
 0x1cc   :  { %v1925_v57 = vadd.f32 %v3791_v58, %v1906_v36  ;;  %1954 = vst [vmem:[#allocation14] sm:$0xff] %v2086_v7 }
 0x1cd   :  { %2354 = shalt.err (!%p2351_p6)
}
 0x1ce   :  { %1994 = dma.vmem_to_hbm [thread:$0]  %s1992_s11, 128, %s3899_s8, [#allocation15]   ;;  %v1926_v40 = vmul.f32 0.033333335, %v1925_v57  ;;  %v2222_v51 = vld [vmem:[#allocation7] sm:$0xff] }
 0x1cf   :  { %s2409_s15 = smov [#allocation13]  }
 0x1d0   :  { %s1981_s16 = sshll.u32 %s2409_s15, 4  ;;  %v1927_v25 = vadd.f32 %v2222_v51, %v1926_v40  ;;  %s1982_s16 = int_to_ptr.vmem [resolvable:$true] %s1981_s16 }
 0x1d1   :  { %s2363_s17 = scalar_lea.vmem %s1982_s16, 128  ;;  %p2368_p8 = scmp.lt.s32.totalorder %s1982_s16, %s1982_s16 }
 0x1d2   :  { %v2085_v19 = vclamps-f32 %v1927_v25, 12.566371  ;;  %p2364_p7 = scmp.ne.s32.totalorder %s1982_s16, %s2363_s17  ;;  %p2369_p9 = scmp.lt.s32.totalorder %s2363_s17, %s2363_s17 }
 0x1d4   :  { %1951 = vst [vmem:[#allocation13] sm:$0xff] %v2085_v19  ;;  %p2370_p10 = por %p2369_p9, %p2368_p8 }
 0x1d6   :  { %p2371_p11 = pnand %p2370_p10, %p2364_p7 }
 0x1d8   :  { %2374 = shalt.err (!%p2371_p11)
}
 0x1d9   :  { %1984 = dma.vmem_to_hbm [thread:$0]  %s1982_s16, 128, %s3898_s7, [#allocation12]  }
 0x1da   :  { %2389 = dma.done.wait [#allocation4], 128  }
 0x1db   :  { %2390 = vsyncadd [#allocation4], 4294967168 }
 0x1dc   :  { %2391 = dma.done.wait [#allocation12], 256  }
 0x1dd   :  { %2392 = vsyncadd [#allocation12], 4294967040 }
 0x1de   :  { %2393 = dma.done.wait [#allocation15], 128  }
 0x1df   :  { %2394 = vsyncadd [#allocation15], 4294967168 }
 0x1e0   :  { %2007 = vsyncpa [#allocation3], 1 }
 0x1e1   :  { %2008 = vsyncpa [#allocation6], 1 }
 0x1e2   :  { %2009 = vsyncpa [#allocation9], 1 }
 0x1e3   :  { %2010 = vsyncpa [#allocation4], 1 }
 0x1e4   :  { %2011 = vsyncpa [#allocation12], 1 }
 0x1e5   :  { %2012 = vsyncpa [#allocation15], 1 }

</bundles_post_ra>
